<compile_context>
chip_gen: v7x
topology: tpu7x:2x2x1
jax: 0.10.0
libtpu: 0.0.40
codegen_flags: <defaults>
</compile_context>

<pallas_src>
import math

import jax
import jax.numpy as jnp
from jax import lax
from jax.experimental import pallas as pl
from jax.experimental.pallas import tpu as pltpu

# ------------------------------ tiny BERT config ------------------------------
VOCAB = 128
HIDDEN = 32
N_HEADS = 4
HEAD_DIM = HIDDEN // N_HEADS
N_LAYERS = 2
INTERMEDIATE = 64
MAX_POS = 64
TYPE_VOCAB = 2
NUM_LABELS = 9
LN_EPS = 1e-12

PAD_COLS = 128            # lane-dense packing width for weight slabs
PAD_LABELS = PAD_COLS     # classification head padded to 128 lanes (sliced back)

# ------------------------- packed weight slab layout --------------------------
# wmat (compute dtype): per layer [wqkv(32 rows) | wo(32) | w1(32) | w2(64)],
#                       then cls_w(32).  All padded to 128 lanes.
MAT_WQKV_OFF = 0
MAT_WO_OFF = HIDDEN
MAT_W1_OFF = 2 * HIDDEN
MAT_W2_OFF = 3 * HIDDEN
MAT_ROWS_PER_LAYER = 3 * HIDDEN + INTERMEDIATE          # 160
MAT_CLS_OFF = N_LAYERS * MAT_ROWS_PER_LAYER              # 320

# wvec (f32): rows [emb_ln_g, emb_ln_b, cls_b] then per layer
#             [bqkv, bo, ln1_g, ln1_b, b1, b2, ln2_g, ln2_b], one 128-lane row each.
VEC_EMB_G, VEC_EMB_B, VEC_CLS_B = 0, 1, 2
VEC_GLOBAL_ROWS = 3
VEC_ROWS_PER_LAYER = 8
(VEC_BQKV, VEC_BO, VEC_LN1G, VEC_LN1B,
 VEC_B1, VEC_B2, VEC_LN2G, VEC_LN2B) = range(8)


# ------------------------------ in-kernel helpers ------------------------------
def _layernorm(x, g, b):
    mean = jnp.mean(x, axis=-1, keepdims=True)
    var = jnp.mean((x - mean) ** 2, axis=-1, keepdims=True)
    return (x - mean) * lax.rsqrt(var + LN_EPS) * g + b


def _gelu(x):
    # TODO(synk): HF BERT uses exact erf-GELU; tanh approximation used here.
    c = math.sqrt(2.0 / math.pi)
    return 0.5 * x * (1.0 + jnp.tanh(c * (x + 0.044715 * x * x * x)))


# ------------------------------ fused forward kernel ---------------------------
def _fused_ner_kernel(x_ref, bias_ref, wmat_ref, wvec_ref, out_ref):
    """Whole BERT-for-token-classification forward for the full batch.

    x_ref    : (B*S, H)    f32  embeddings (word+pos+type, pre-LayerNorm)
    bias_ref : (B*S, B*S)  f32  additive attention bias (padding + batch block)
    wmat_ref : (352, 128)  cdt  packed matrix weights (layout above)
    wvec_ref : (19, 128)   f32  packed bias / LayerNorm vectors
    out_ref  : (B*S, 128)  f32  lane-dense padded logits
    """
    cdt = wmat_ref.dtype                       # bf16 on v6e/v7x, f32 on v5e
    scale = 1.0 / math.sqrt(HEAD_DIM)

    def vrow(row, width):                      # (1, width) f32 bias/LN vector
        return wvec_ref[row:row + 1, :width]

    # --- embedding LayerNorm (f32) ---
    h = _layernorm(x_ref[...], vrow(VEC_EMB_G, HIDDEN), vrow(VEC_EMB_B, HIDDEN))
    bias = bias_ref[...]                       # (B*S, B*S)

    for l in range(N_LAYERS):                  # static unroll over layers
        m0 = l * MAT_ROWS_PER_LAYER
        v0 = VEC_GLOBAL_ROWS + l * VEC_ROWS_PER_LAYER
        wqkv = wmat_ref[m0 + MAT_WQKV_OFF:m0 + MAT_WQKV_OFF + HIDDEN, :3 * HIDDEN]
        wo = wmat_ref[m0 + MAT_WO_OFF:m0 + MAT_WO_OFF + HIDDEN, :HIDDEN]
        w1 = wmat_ref[m0 + MAT_W1_OFF:m0 + MAT_W1_OFF + HIDDEN, :INTERMEDIATE]
        w2 = wmat_ref[m0 + MAT_W2_OFF:m0 + MAT_W2_OFF + INTERMEDIATE, :HIDDEN]

        # --- fused QKV projection: one (B*S, H) @ (H, 3H) matmul ---
        qkv = jnp.dot(h.astype(cdt), wqkv,
                      preferred_element_type=jnp.float32) + vrow(v0 + VEC_BQKV, 3 * HIDDEN)
        qkv_c = qkv.astype(cdt)

        # --- attention: whole batch per head; bias masks padding + cross-batch ---
        ctx_heads = []
        for hd in range(N_HEADS):
            o = hd * HEAD_DIM
            q_h = qkv_c[:, o:o + HEAD_DIM]
            k_h = qkv_c[:, HIDDEN + o:HIDDEN + o + HEAD_DIM]
            v_h = qkv_c[:, 2 * HIDDEN + o:2 * HIDDEN + o + HEAD_DIM]
            s = lax.dot_general(q_h, k_h, (((1,), (1,)), ((), ())),
                                preferred_element_type=jnp.float32)   # q @ k.T
            s = s * scale + bias
            s = s - jnp.max(s, axis=-1, keepdims=True)
            p = jnp.exp(s)
            # NOTE: approx reciprocal (EUP slot) -> tiny relative error vs exact divide.
            p = p * pl.reciprocal(jnp.sum(p, axis=-1, keepdims=True), approx=True)
            ctx_heads.append(jnp.dot(p.astype(cdt), v_h,
                                     preferred_element_type=jnp.float32))
        # heads are lane-contiguous -> single attention output projection matmul
        ctx = jnp.concatenate(ctx_heads, axis=-1)                     # (B*S, H)
        attn = jnp.dot(ctx.astype(cdt), wo,
                       preferred_element_type=jnp.float32) + vrow(v0 + VEC_BO, HIDDEN)
        h = _layernorm(attn + h, vrow(v0 + VEC_LN1G, HIDDEN), vrow(v0 + VEC_LN1B, HIDDEN))

        # --- FFN (up + GELU + down) ---
        ff = jnp.dot(h.astype(cdt), w1,
                     preferred_element_type=jnp.float32) + vrow(v0 + VEC_B1, INTERMEDIATE)
        ff = _gelu(ff)
        ff = jnp.dot(ff.astype(cdt), w2,
                     preferred_element_type=jnp.float32) + vrow(v0 + VEC_B2, HIDDEN)
        h = _layernorm(ff + h, vrow(v0 + VEC_LN2G, HIDDEN), vrow(v0 + VEC_LN2B, HIDDEN))

    # --- classification head, 128-lane padded for lane-dense stores ---
    clsw = wmat_ref[MAT_CLS_OFF:MAT_CLS_OFF + HIDDEN, :]
    logits = jnp.dot(h.astype(cdt), clsw,
                     preferred_element_type=jnp.float32) + vrow(VEC_CLS_B, PAD_LABELS)
    out_ref[...] = logits.astype(out_ref.dtype)


# ------------------------------ params & packing -------------------------------
def init_params(key):
    def nrm(k, shape):
        return 0.02 * jax.random.normal(k, shape, dtype=jnp.float32)

    ks = jax.random.split(key, 8)
    return {
        "word_emb": nrm(ks[0], (VOCAB, HIDDEN)),
        "pos_emb": nrm(ks[1], (MAX_POS, HIDDEN)),
        "type_emb": nrm(ks[2], (TYPE_VOCAB, HIDDEN)),
        "emb_ln_g": jnp.ones((1, HIDDEN), jnp.float32),
        "emb_ln_b": jnp.zeros((1, HIDDEN), jnp.float32),
        "wqkv": nrm(ks[3], (N_LAYERS, HIDDEN, 3 * HIDDEN)),
        "bqkv": jnp.zeros((N_LAYERS, 1, 3 * HIDDEN), jnp.float32),
        "wo": nrm(ks[4], (N_LAYERS, HIDDEN, HIDDEN)),
        "bo": jnp.zeros((N_LAYERS, 1, HIDDEN), jnp.float32),
        "ln1_g": jnp.ones((N_LAYERS, 1, HIDDEN), jnp.float32),
        "ln1_b": jnp.zeros((N_LAYERS, 1, HIDDEN), jnp.float32),
        "w1": nrm(ks[5], (N_LAYERS, HIDDEN, INTERMEDIATE)),
        "b1": jnp.zeros((N_LAYERS, 1, INTERMEDIATE), jnp.float32),
        "w2": nrm(ks[6], (N_LAYERS, INTERMEDIATE, HIDDEN)),
        "b2": jnp.zeros((N_LAYERS, 1, HIDDEN), jnp.float32),
        "ln2_g": jnp.ones((N_LAYERS, 1, HIDDEN), jnp.float32),
        "ln2_b": jnp.zeros((N_LAYERS, 1, HIDDEN), jnp.float32),
        "cls_w": nrm(ks[7], (HIDDEN, NUM_LABELS)),
        "cls_b": jnp.zeros((NUM_LABELS,), jnp.float32),
    }


def _compute_dtype():
    # bf16 matmul operands on v6e/v7x (MXU/VPU-native, halves DMA + vreg bytes);
    # keep f32 on v5e and older (no bf16 VALU/EUP -> upcasts would eat the gain).
    try:
        kind = jax.devices()[0].device_kind.lower()
    except Exception:
        return jnp.float32
    if ("v6" in kind) or ("v7" in kind) or ("tpu7" in kind):
        return jnp.bfloat16
    return jnp.float32


def _pad_lanes(w):
    w = jnp.asarray(w, jnp.float32)
    return jnp.pad(w, ((0, 0), (0, PAD_COLS - w.shape[-1])))


def _vec_row(v):
    return _pad_lanes(jnp.asarray(v, jnp.float32).reshape(1, -1))


def pack_params(params, compute_dtype=None):
    """Pack all weights into two VMEM-friendly slabs (called once, outside jit)."""
    if compute_dtype is None:
        compute_dtype = _compute_dtype()

    mat_rows = []
    for l in range(N_LAYERS):
        mat_rows += [_pad_lanes(params["wqkv"][l]), _pad_lanes(params["wo"][l]),
                     _pad_lanes(params["w1"][l]), _pad_lanes(params["w2"][l])]
    mat_rows.append(_pad_lanes(params["cls_w"]))
    wmat = jnp.concatenate(mat_rows, axis=0).astype(compute_dtype)    # (352, 128)

    vec_rows = [_vec_row(params["emb_ln_g"]), _vec_row(params["emb_ln_b"]),
                _vec_row(params["cls_b"])]
    for l in range(N_LAYERS):
        vec_rows += [_vec_row(params[name][l]) for name in
                     ("bqkv", "bo", "ln1_g", "ln1_b", "b1", "b2", "ln2_g", "ln2_b")]
    wvec = jnp.concatenate(vec_rows, axis=0)                          # (19, 128) f32

    return {"word_emb": params["word_emb"], "pos_emb": params["pos_emb"],
            "type_emb": params["type_emb"], "wmat": wmat, "wvec": wvec}


# ------------------------------ forward (wrapper) -------------------------------
def ner_forward(packed, input_ids, attention_mask, labels=None):
    """Equivalent of NERModel.forward (eval mode, dropout = identity)."""
    B, S = input_ids.shape
    R = B * S

    # embedding gathers (plain-JAX glue)
    we = jnp.take(packed["word_emb"], input_ids, axis=0)              # (B, S, H)
    pe = packed["pos_emb"][:S][None, :, :]
    te = packed["type_emb"][0][None, None, :]                         # token_type_ids = 0
    emb = (we + pe + te).reshape(R, HIDDEN).astype(jnp.float32)

    # additive attention bias: key-padding mask + block-diagonal "same batch" mask
    key_ok = attention_mask.reshape(R) > 0
    batch_id = jnp.arange(R, dtype=jnp.int32) // S
    same_batch = batch_id[:, None] == batch_id[None, :]
    bias = jnp.where(same_batch & key_ok[None, :], 0.0, -1e9).astype(jnp.float32)

    logits_padded = pl.pallas_call(
        _fused_ner_kernel,
        out_shape=jax.ShapeDtypeStruct((R, PAD_LABELS), jnp.float32),
        grid_spec=pl.GridSpec(
            # Single grid step: whole batch in one block; per-step pipeline
            # overhead is paid exactly once and matmuls see M = B*S rows.
            # TODO(synk): on v7x (2 TensorCores) split token rows across cores
            # (CORE_PARALLEL) once B*S is large enough to feed both cores.
            grid=(1,),
            in_specs=[
                pl.BlockSpec((R, HIDDEN), lambda i: (0, 0)),
                pl.BlockSpec((R, R), lambda i: (0, 0)),
                pl.BlockSpec(packed["wmat"].shape, lambda i: (0, 0)),
                pl.BlockSpec(packed["wvec"].shape, lambda i: (0, 0)),
            ],
            out_specs=pl.BlockSpec((R, PAD_LABELS), lambda i: (0, 0)),
        ),
        compiler_params=pltpu.CompilerParams(dimension_semantics=("arbitrary",)),
    )(emb, bias, packed["wmat"], packed["wvec"])

    logits = logits_padded[:, :NUM_LABELS].reshape(B, S, NUM_LABELS)

    if labels is not None:
        # token-level cross-entropy with ignore_index = -100 (plain-JAX glue)
        logp = jax.nn.log_softmax(logits, axis=-1)
        valid = labels != -100
        safe = jnp.where(valid, labels, 0)
        nll = -jnp.take_along_axis(logp, safe[..., None], axis=-1)[..., 0]
        loss = jnp.sum(nll * valid) / jnp.maximum(jnp.sum(valid), 1)
        return loss, logits
    return logits


# ----------------------------------- main ---------------------------------------
if __name__ == "__main__":
    key = jax.random.PRNGKey(0)
    k_param, k_ids, k_lbl = jax.random.split(key, 3)

    B, S = 2, 8
    params = init_params(k_param)
    packed = pack_params(params)

    input_ids = jax.random.randint(k_ids, (B, S), 0, VOCAB, dtype=jnp.int32)
    attention_mask = jnp.array(
        [[1, 1, 1, 1, 1, 1, 1, 1],
         [1, 1, 1, 1, 1, 1, 0, 0]], dtype=jnp.int32)
    labels = jax.random.randint(k_lbl, (B, S), 0, NUM_LABELS, dtype=jnp.int32)
    labels = jnp.where(attention_mask == 1, labels, -100)

    fwd = jax.jit(ner_forward)
    loss, logits = fwd(packed, input_ids, attention_mask, labels)
    jax.block_until_ready((loss, logits))

    assert logits.shape == (B, S, NUM_LABELS)
    assert bool(jnp.isfinite(loss))
    print("KERNEL_OK")
</pallas_src>

<mosaic_0001>
module attributes {stable_mosaic.version = 11 : i64} {
  func.func @_fused_ner_kernel(%arg0: i32, %arg1: memref<16x32xf32, #tpu.memory_space<vmem>>, %arg2: memref<16x16xf32, #tpu.memory_space<vmem>>, %arg3: memref<352x128xf32, #tpu.memory_space<vmem>>, %arg4: memref<19x128xf32, #tpu.memory_space<vmem>>, %arg5: memref<16x128xf32, #tpu.memory_space<vmem>>) attributes {dimension_semantics = [#tpu.dimension_semantics<arbitrary>], iteration_bounds = array<i64: 1>, scalar_prefetch = 0 : i64, scratch_operands = 0 : i64, tpu.core_type = #tpu.core_type<tc>, window_params = [{pipeline_mode = #tpu.pipeline_mode<synchronous>, transform_indices = @transform_0, window_bounds = array<i64: 16, 32>}, {pipeline_mode = #tpu.pipeline_mode<synchronous>, transform_indices = @transform_1, window_bounds = array<i64: 16, 16>}, {pipeline_mode = #tpu.pipeline_mode<synchronous>, transform_indices = @transform_2, window_bounds = array<i64: 352, 128>}, {pipeline_mode = #tpu.pipeline_mode<synchronous>, transform_indices = @transform_3, window_bounds = array<i64: 19, 128>}, {pipeline_mode = #tpu.pipeline_mode<synchronous>, transform_indices = @transform_4, window_bounds = array<i64: 16, 128>}]} {
    %c0 = arith.constant 0 : index
    %c0_0 = arith.constant 0 : index
    %0 = vector.load %arg1[%c0, %c0_0] : memref<16x32xf32, #tpu.memory_space<vmem>>, vector<16x32xf32>
    %c0_1 = arith.constant 0 : index
    %c0_2 = arith.constant 0 : index
    %1 = vector.load %arg4[%c0_1, %c0_2] : memref<19x128xf32, #tpu.memory_space<vmem>>, vector<1x32xf32>
    %c1 = arith.constant 1 : index
    %c0_3 = arith.constant 0 : index
    %2 = vector.load %arg4[%c1, %c0_3] : memref<19x128xf32, #tpu.memory_space<vmem>>, vector<1x32xf32>
    %cst = arith.constant dense<0.000000e+00> : vector<16xf32>
    %3 = vector.multi_reduction <add>, %0, %cst [1] : vector<16x32xf32> to vector<16xf32>
    %4 = vector.shape_cast %3 : vector<16xf32> to vector<16x1xf32>
    %cst_4 = arith.constant 3.200000e+01 : f32
    %5 = vector.broadcast %cst_4 : f32 to vector<16x1xf32>
    %6 = arith.divf %4, %5 : vector<16x1xf32>
    %7 = vector.broadcast %6 : vector<16x1xf32> to vector<16x32xf32>
    %8 = arith.subf %0, %7 : vector<16x32xf32>
    %9 = arith.mulf %8, %8 : vector<16x32xf32>
    %cst_5 = arith.constant dense<0.000000e+00> : vector<16xf32>
    %10 = vector.multi_reduction <add>, %9, %cst_5 [1] : vector<16x32xf32> to vector<16xf32>
    %11 = vector.shape_cast %10 : vector<16xf32> to vector<16x1xf32>
    %cst_6 = arith.constant 3.200000e+01 : f32
    %12 = vector.broadcast %cst_6 : f32 to vector<16x1xf32>
    %13 = arith.divf %11, %12 : vector<16x1xf32>
    %14 = vector.broadcast %6 : vector<16x1xf32> to vector<16x32xf32>
    %15 = arith.subf %0, %14 : vector<16x32xf32>
    %cst_7 = arith.constant 9.99999996E-13 : f32
    %16 = vector.broadcast %cst_7 : f32 to vector<16x1xf32>
    %17 = arith.addf %13, %16 : vector<16x1xf32>
    %18 = math.rsqrt %17 : vector<16x1xf32>
    %19 = vector.broadcast %18 : vector<16x1xf32> to vector<16x32xf32>
    %20 = arith.mulf %15, %19 : vector<16x32xf32>
    %21 = vector.broadcast %1 : vector<1x32xf32> to vector<16x32xf32>
    %22 = arith.mulf %20, %21 : vector<16x32xf32>
    %23 = vector.broadcast %2 : vector<1x32xf32> to vector<16x32xf32>
    %24 = arith.addf %22, %23 : vector<16x32xf32>
    %c0_8 = arith.constant 0 : index
    %c0_9 = arith.constant 0 : index
    %25 = vector.load %arg2[%c0_8, %c0_9] : memref<16x16xf32, #tpu.memory_space<vmem>>, vector<16x16xf32>
    %c0_10 = arith.constant 0 : index
    %c0_11 = arith.constant 0 : index
    %26 = vector.load %arg3[%c0_10, %c0_11] : memref<352x128xf32, #tpu.memory_space<vmem>>, vector<32x96xf32>
    %c32 = arith.constant 32 : index
    %c0_12 = arith.constant 0 : index
    %27 = vector.load %arg3[%c32, %c0_12] : memref<352x128xf32, #tpu.memory_space<vmem>>, vector<32x32xf32>
    %c64 = arith.constant 64 : index
    %c0_13 = arith.constant 0 : index
    %28 = vector.load %arg3[%c64, %c0_13] : memref<352x128xf32, #tpu.memory_space<vmem>>, vector<32x64xf32>
    %c96 = arith.constant 96 : index
    %c0_14 = arith.constant 0 : index
    %29 = vector.load %arg3[%c96, %c0_14] : memref<352x128xf32, #tpu.memory_space<vmem>>, vector<64x32xf32>
    %cst_15 = arith.constant dense<0.000000e+00> : vector<16x96xf32>
    %30 = tpu.matmul %24, %26, %cst_15 {dimension_numbers = #tpu.dot_dimension_numbers<[1], [0], [0], [1], [0, 0, 1, 1], [], []>} : vector<16x32xf32>, vector<32x96xf32>, vector<16x96xf32> -> vector<16x96xf32>
    %c3 = arith.constant 3 : index
    %c0_16 = arith.constant 0 : index
    %31 = vector.load %arg4[%c3, %c0_16] : memref<19x128xf32, #tpu.memory_space<vmem>>, vector<1x96xf32>
    %32 = vector.broadcast %31 : vector<1x96xf32> to vector<16x96xf32>
    %33 = arith.addf %30, %32 : vector<16x96xf32>
    %34 = vector.extract_strided_slice %33 {offsets = [0, 0], sizes = [16, 8], strides = [1, 1]} : vector<16x96xf32> to vector<16x8xf32>
    %35 = vector.extract_strided_slice %33 {offsets = [0, 32], sizes = [16, 8], strides = [1, 1]} : vector<16x96xf32> to vector<16x8xf32>
    %36 = vector.extract_strided_slice %33 {offsets = [0, 64], sizes = [16, 8], strides = [1, 1]} : vector<16x96xf32> to vector<16x8xf32>
    %cst_17 = arith.constant dense<0.000000e+00> : vector<16x16xf32>
    %37 = tpu.matmul %34, %35, %cst_17 {dimension_numbers = #tpu.dot_dimension_numbers<[1], [1], [0], [0], [0, 0, 1, 0], [], []>} : vector<16x8xf32>, vector<16x8xf32>, vector<16x16xf32> -> vector<16x16xf32>
    %cst_18 = arith.constant 0.353553385 : f32
    %38 = vector.broadcast %cst_18 : f32 to vector<16x16xf32>
    %39 = arith.mulf %37, %38 : vector<16x16xf32>
    %40 = arith.addf %39, %25 : vector<16x16xf32>
    %cst_19 = arith.constant dense<0xFF800000> : vector<16xf32>
    %41 = vector.multi_reduction <maximumf>, %40, %cst_19 [1] : vector<16x16xf32> to vector<16xf32>
    %42 = vector.shape_cast %41 : vector<16xf32> to vector<16x1xf32>
    %43 = vector.broadcast %42 : vector<16x1xf32> to vector<16x16xf32>
    %44 = arith.subf %40, %43 : vector<16x16xf32>
    %45 = math.exp %44 : vector<16x16xf32>
    %cst_20 = arith.constant dense<0.000000e+00> : vector<16xf32>
    %46 = vector.multi_reduction <add>, %45, %cst_20 [1] : vector<16x16xf32> to vector<16xf32>
    %47 = vector.shape_cast %46 : vector<16xf32> to vector<16x1xf32>
    %48 = tpu.reciprocal %47 {approx = true} : vector<16x1xf32> -> vector<16x1xf32>
    %49 = vector.broadcast %48 : vector<16x1xf32> to vector<16x16xf32>
    %50 = arith.mulf %45, %49 : vector<16x16xf32>
    %cst_21 = arith.constant dense<0.000000e+00> : vector<16x8xf32>
    %51 = tpu.matmul %50, %36, %cst_21 {dimension_numbers = #tpu.dot_dimension_numbers<[1], [0], [0], [1], [0, 0, 1, 1], [], []>} : vector<16x16xf32>, vector<16x8xf32>, vector<16x8xf32> -> vector<16x8xf32>
    %52 = vector.extract_strided_slice %33 {offsets = [0, 8], sizes = [16, 8], strides = [1, 1]} : vector<16x96xf32> to vector<16x8xf32>
    %53 = vector.extract_strided_slice %33 {offsets = [0, 40], sizes = [16, 8], strides = [1, 1]} : vector<16x96xf32> to vector<16x8xf32>
    %54 = vector.extract_strided_slice %33 {offsets = [0, 72], sizes = [16, 8], strides = [1, 1]} : vector<16x96xf32> to vector<16x8xf32>
    %cst_22 = arith.constant dense<0.000000e+00> : vector<16x16xf32>
    %55 = tpu.matmul %52, %53, %cst_22 {dimension_numbers = #tpu.dot_dimension_numbers<[1], [1], [0], [0], [0, 0, 1, 0], [], []>} : vector<16x8xf32>, vector<16x8xf32>, vector<16x16xf32> -> vector<16x16xf32>
    %cst_23 = arith.constant 0.353553385 : f32
    %56 = vector.broadcast %cst_23 : f32 to vector<16x16xf32>
    %57 = arith.mulf %55, %56 : vector<16x16xf32>
    %58 = arith.addf %57, %25 : vector<16x16xf32>
    %cst_24 = arith.constant dense<0xFF800000> : vector<16xf32>
    %59 = vector.multi_reduction <maximumf>, %58, %cst_24 [1] : vector<16x16xf32> to vector<16xf32>
    %60 = vector.shape_cast %59 : vector<16xf32> to vector<16x1xf32>
    %61 = vector.broadcast %60 : vector<16x1xf32> to vector<16x16xf32>
    %62 = arith.subf %58, %61 : vector<16x16xf32>
    %63 = math.exp %62 : vector<16x16xf32>
    %cst_25 = arith.constant dense<0.000000e+00> : vector<16xf32>
    %64 = vector.multi_reduction <add>, %63, %cst_25 [1] : vector<16x16xf32> to vector<16xf32>
    %65 = vector.shape_cast %64 : vector<16xf32> to vector<16x1xf32>
    %66 = tpu.reciprocal %65 {approx = true} : vector<16x1xf32> -> vector<16x1xf32>
    %67 = vector.broadcast %66 : vector<16x1xf32> to vector<16x16xf32>
    %68 = arith.mulf %63, %67 : vector<16x16xf32>
    %cst_26 = arith.constant dense<0.000000e+00> : vector<16x8xf32>
    %69 = tpu.matmul %68, %54, %cst_26 {dimension_numbers = #tpu.dot_dimension_numbers<[1], [0], [0], [1], [0, 0, 1, 1], [], []>} : vector<16x16xf32>, vector<16x8xf32>, vector<16x8xf32> -> vector<16x8xf32>
    %70 = vector.extract_strided_slice %33 {offsets = [0, 16], sizes = [16, 8], strides = [1, 1]} : vector<16x96xf32> to vector<16x8xf32>
    %71 = vector.extract_strided_slice %33 {offsets = [0, 48], sizes = [16, 8], strides = [1, 1]} : vector<16x96xf32> to vector<16x8xf32>
    %72 = vector.extract_strided_slice %33 {offsets = [0, 80], sizes = [16, 8], strides = [1, 1]} : vector<16x96xf32> to vector<16x8xf32>
    %cst_27 = arith.constant dense<0.000000e+00> : vector<16x16xf32>
    %73 = tpu.matmul %70, %71, %cst_27 {dimension_numbers = #tpu.dot_dimension_numbers<[1], [1], [0], [0], [0, 0, 1, 0], [], []>} : vector<16x8xf32>, vector<16x8xf32>, vector<16x16xf32> -> vector<16x16xf32>
    %cst_28 = arith.constant 0.353553385 : f32
    %74 = vector.broadcast %cst_28 : f32 to vector<16x16xf32>
    %75 = arith.mulf %73, %74 : vector<16x16xf32>
    %76 = arith.addf %75, %25 : vector<16x16xf32>
    %cst_29 = arith.constant dense<0xFF800000> : vector<16xf32>
    %77 = vector.multi_reduction <maximumf>, %76, %cst_29 [1] : vector<16x16xf32> to vector<16xf32>
    %78 = vector.shape_cast %77 : vector<16xf32> to vector<16x1xf32>
    %79 = vector.broadcast %78 : vector<16x1xf32> to vector<16x16xf32>
    %80 = arith.subf %76, %79 : vector<16x16xf32>
    %81 = math.exp %80 : vector<16x16xf32>
    %cst_30 = arith.constant dense<0.000000e+00> : vector<16xf32>
    %82 = vector.multi_reduction <add>, %81, %cst_30 [1] : vector<16x16xf32> to vector<16xf32>
    %83 = vector.shape_cast %82 : vector<16xf32> to vector<16x1xf32>
    %84 = tpu.reciprocal %83 {approx = true} : vector<16x1xf32> -> vector<16x1xf32>
    %85 = vector.broadcast %84 : vector<16x1xf32> to vector<16x16xf32>
    %86 = arith.mulf %81, %85 : vector<16x16xf32>
    %cst_31 = arith.constant dense<0.000000e+00> : vector<16x8xf32>
    %87 = tpu.matmul %86, %72, %cst_31 {dimension_numbers = #tpu.dot_dimension_numbers<[1], [0], [0], [1], [0, 0, 1, 1], [], []>} : vector<16x16xf32>, vector<16x8xf32>, vector<16x8xf32> -> vector<16x8xf32>
    %88 = vector.extract_strided_slice %33 {offsets = [0, 24], sizes = [16, 8], strides = [1, 1]} : vector<16x96xf32> to vector<16x8xf32>
    %89 = vector.extract_strided_slice %33 {offsets = [0, 56], sizes = [16, 8], strides = [1, 1]} : vector<16x96xf32> to vector<16x8xf32>
    %90 = vector.extract_strided_slice %33 {offsets = [0, 88], sizes = [16, 8], strides = [1, 1]} : vector<16x96xf32> to vector<16x8xf32>
    %cst_32 = arith.constant dense<0.000000e+00> : vector<16x16xf32>
    %91 = tpu.matmul %88, %89, %cst_32 {dimension_numbers = #tpu.dot_dimension_numbers<[1], [1], [0], [0], [0, 0, 1, 0], [], []>} : vector<16x8xf32>, vector<16x8xf32>, vector<16x16xf32> -> vector<16x16xf32>
    %cst_33 = arith.constant 0.353553385 : f32
    %92 = vector.broadcast %cst_33 : f32 to vector<16x16xf32>
    %93 = arith.mulf %91, %92 : vector<16x16xf32>
    %94 = arith.addf %93, %25 : vector<16x16xf32>
    %cst_34 = arith.constant dense<0xFF800000> : vector<16xf32>
    %95 = vector.multi_reduction <maximumf>, %94, %cst_34 [1] : vector<16x16xf32> to vector<16xf32>
    %96 = vector.shape_cast %95 : vector<16xf32> to vector<16x1xf32>
    %97 = vector.broadcast %96 : vector<16x1xf32> to vector<16x16xf32>
    %98 = arith.subf %94, %97 : vector<16x16xf32>
    %99 = math.exp %98 : vector<16x16xf32>
    %cst_35 = arith.constant dense<0.000000e+00> : vector<16xf32>
    %100 = vector.multi_reduction <add>, %99, %cst_35 [1] : vector<16x16xf32> to vector<16xf32>
    %101 = vector.shape_cast %100 : vector<16xf32> to vector<16x1xf32>
    %102 = tpu.reciprocal %101 {approx = true} : vector<16x1xf32> -> vector<16x1xf32>
    %103 = vector.broadcast %102 : vector<16x1xf32> to vector<16x16xf32>
    %104 = arith.mulf %99, %103 : vector<16x16xf32>
    %cst_36 = arith.constant dense<0.000000e+00> : vector<16x8xf32>
    %105 = tpu.matmul %104, %90, %cst_36 {dimension_numbers = #tpu.dot_dimension_numbers<[1], [0], [0], [1], [0, 0, 1, 1], [], []>} : vector<16x16xf32>, vector<16x8xf32>, vector<16x8xf32> -> vector<16x8xf32>
    %106 = tpu.concatenate %51, %69, %87, %105 in 1 : vector<16x8xf32>, vector<16x8xf32>, vector<16x8xf32>, vector<16x8xf32> -> vector<16x32xf32>
    %cst_37 = arith.constant dense<0.000000e+00> : vector<16x32xf32>
    %107 = tpu.matmul %106, %27, %cst_37 {dimension_numbers = #tpu.dot_dimension_numbers<[1], [0], [0], [1], [0, 0, 1, 1], [], []>} : vector<16x32xf32>, vector<32x32xf32>, vector<16x32xf32> -> vector<16x32xf32>
    %c4 = arith.constant 4 : index
    %c0_38 = arith.constant 0 : index
    %108 = vector.load %arg4[%c4, %c0_38] : memref<19x128xf32, #tpu.memory_space<vmem>>, vector<1x32xf32>
    %109 = vector.broadcast %108 : vector<1x32xf32> to vector<16x32xf32>
    %110 = arith.addf %107, %109 : vector<16x32xf32>
    %111 = arith.addf %110, %24 : vector<16x32xf32>
    %c5 = arith.constant 5 : index
    %c0_39 = arith.constant 0 : index
    %112 = vector.load %arg4[%c5, %c0_39] : memref<19x128xf32, #tpu.memory_space<vmem>>, vector<1x32xf32>
    %c6 = arith.constant 6 : index
    %c0_40 = arith.constant 0 : index
    %113 = vector.load %arg4[%c6, %c0_40] : memref<19x128xf32, #tpu.memory_space<vmem>>, vector<1x32xf32>
    %cst_41 = arith.constant dense<0.000000e+00> : vector<16xf32>
    %114 = vector.multi_reduction <add>, %111, %cst_41 [1] : vector<16x32xf32> to vector<16xf32>
    %115 = vector.shape_cast %114 : vector<16xf32> to vector<16x1xf32>
    %cst_42 = arith.constant 3.200000e+01 : f32
    %116 = vector.broadcast %cst_42 : f32 to vector<16x1xf32>
    %117 = arith.divf %115, %116 : vector<16x1xf32>
    %118 = vector.broadcast %117 : vector<16x1xf32> to vector<16x32xf32>
    %119 = arith.subf %111, %118 : vector<16x32xf32>
    %120 = arith.mulf %119, %119 : vector<16x32xf32>
    %cst_43 = arith.constant dense<0.000000e+00> : vector<16xf32>
    %121 = vector.multi_reduction <add>, %120, %cst_43 [1] : vector<16x32xf32> to vector<16xf32>
    %122 = vector.shape_cast %121 : vector<16xf32> to vector<16x1xf32>
    %cst_44 = arith.constant 3.200000e+01 : f32
    %123 = vector.broadcast %cst_44 : f32 to vector<16x1xf32>
    %124 = arith.divf %122, %123 : vector<16x1xf32>
    %125 = vector.broadcast %117 : vector<16x1xf32> to vector<16x32xf32>
    %126 = arith.subf %111, %125 : vector<16x32xf32>
    %cst_45 = arith.constant 9.99999996E-13 : f32
    %127 = vector.broadcast %cst_45 : f32 to vector<16x1xf32>
    %128 = arith.addf %124, %127 : vector<16x1xf32>
    %129 = math.rsqrt %128 : vector<16x1xf32>
    %130 = vector.broadcast %129 : vector<16x1xf32> to vector<16x32xf32>
    %131 = arith.mulf %126, %130 : vector<16x32xf32>
    %132 = vector.broadcast %112 : vector<1x32xf32> to vector<16x32xf32>
    %133 = arith.mulf %131, %132 : vector<16x32xf32>
    %134 = vector.broadcast %113 : vector<1x32xf32> to vector<16x32xf32>
    %135 = arith.addf %133, %134 : vector<16x32xf32>
    %cst_46 = arith.constant dense<0.000000e+00> : vector<16x64xf32>
    %136 = tpu.matmul %135, %28, %cst_46 {dimension_numbers = #tpu.dot_dimension_numbers<[1], [0], [0], [1], [0, 0, 1, 1], [], []>} : vector<16x32xf32>, vector<32x64xf32>, vector<16x64xf32> -> vector<16x64xf32>
    %c7 = arith.constant 7 : index
    %c0_47 = arith.constant 0 : index
    %137 = vector.load %arg4[%c7, %c0_47] : memref<19x128xf32, #tpu.memory_space<vmem>>, vector<1x64xf32>
    %138 = vector.broadcast %137 : vector<1x64xf32> to vector<16x64xf32>
    %139 = arith.addf %136, %138 : vector<16x64xf32>
    %cst_48 = arith.constant 5.000000e-01 : f32
    %140 = vector.broadcast %cst_48 : f32 to vector<16x64xf32>
    %141 = arith.mulf %140, %139 : vector<16x64xf32>
    %cst_49 = arith.constant 4.471500e-02 : f32
    %142 = vector.broadcast %cst_49 : f32 to vector<16x64xf32>
    %143 = arith.mulf %142, %139 : vector<16x64xf32>
    %144 = arith.mulf %143, %139 : vector<16x64xf32>
    %145 = arith.mulf %144, %139 : vector<16x64xf32>
    %146 = arith.addf %139, %145 : vector<16x64xf32>
    %cst_50 = arith.constant 0.797884583 : f32
    %147 = vector.broadcast %cst_50 : f32 to vector<16x64xf32>
    %148 = arith.mulf %147, %146 : vector<16x64xf32>
    %149 = math.tanh %148 : vector<16x64xf32>
    %cst_51 = arith.constant 1.000000e+00 : f32
    %150 = vector.broadcast %cst_51 : f32 to vector<16x64xf32>
    %151 = arith.addf %150, %149 : vector<16x64xf32>
    %152 = arith.mulf %141, %151 : vector<16x64xf32>
    %cst_52 = arith.constant dense<0.000000e+00> : vector<16x32xf32>
    %153 = tpu.matmul %152, %29, %cst_52 {dimension_numbers = #tpu.dot_dimension_numbers<[1], [0], [0], [1], [0, 0, 1, 1], [], []>} : vector<16x64xf32>, vector<64x32xf32>, vector<16x32xf32> -> vector<16x32xf32>
    %c8 = arith.constant 8 : index
    %c0_53 = arith.constant 0 : index
    %154 = vector.load %arg4[%c8, %c0_53] : memref<19x128xf32, #tpu.memory_space<vmem>>, vector<1x32xf32>
    %155 = vector.broadcast %154 : vector<1x32xf32> to vector<16x32xf32>
    %156 = arith.addf %153, %155 : vector<16x32xf32>
    %157 = arith.addf %156, %135 : vector<16x32xf32>
    %c9 = arith.constant 9 : index
    %c0_54 = arith.constant 0 : index
    %158 = vector.load %arg4[%c9, %c0_54] : memref<19x128xf32, #tpu.memory_space<vmem>>, vector<1x32xf32>
    %c10 = arith.constant 10 : index
    %c0_55 = arith.constant 0 : index
    %159 = vector.load %arg4[%c10, %c0_55] : memref<19x128xf32, #tpu.memory_space<vmem>>, vector<1x32xf32>
    %cst_56 = arith.constant dense<0.000000e+00> : vector<16xf32>
    %160 = vector.multi_reduction <add>, %157, %cst_56 [1] : vector<16x32xf32> to vector<16xf32>
    %161 = vector.shape_cast %160 : vector<16xf32> to vector<16x1xf32>
    %cst_57 = arith.constant 3.200000e+01 : f32
    %162 = vector.broadcast %cst_57 : f32 to vector<16x1xf32>
    %163 = arith.divf %161, %162 : vector<16x1xf32>
    %164 = vector.broadcast %163 : vector<16x1xf32> to vector<16x32xf32>
    %165 = arith.subf %157, %164 : vector<16x32xf32>
    %166 = arith.mulf %165, %165 : vector<16x32xf32>
    %cst_58 = arith.constant dense<0.000000e+00> : vector<16xf32>
    %167 = vector.multi_reduction <add>, %166, %cst_58 [1] : vector<16x32xf32> to vector<16xf32>
    %168 = vector.shape_cast %167 : vector<16xf32> to vector<16x1xf32>
    %cst_59 = arith.constant 3.200000e+01 : f32
    %169 = vector.broadcast %cst_59 : f32 to vector<16x1xf32>
    %170 = arith.divf %168, %169 : vector<16x1xf32>
    %171 = vector.broadcast %163 : vector<16x1xf32> to vector<16x32xf32>
    %172 = arith.subf %157, %171 : vector<16x32xf32>
    %cst_60 = arith.constant 9.99999996E-13 : f32
    %173 = vector.broadcast %cst_60 : f32 to vector<16x1xf32>
    %174 = arith.addf %170, %173 : vector<16x1xf32>
    %175 = math.rsqrt %174 : vector<16x1xf32>
    %176 = vector.broadcast %175 : vector<16x1xf32> to vector<16x32xf32>
    %177 = arith.mulf %172, %176 : vector<16x32xf32>
    %178 = vector.broadcast %158 : vector<1x32xf32> to vector<16x32xf32>
    %179 = arith.mulf %177, %178 : vector<16x32xf32>
    %180 = vector.broadcast %159 : vector<1x32xf32> to vector<16x32xf32>
    %181 = arith.addf %179, %180 : vector<16x32xf32>
    %c160 = arith.constant 160 : index
    %c0_61 = arith.constant 0 : index
    %182 = vector.load %arg3[%c160, %c0_61] : memref<352x128xf32, #tpu.memory_space<vmem>>, vector<32x96xf32>
    %c192 = arith.constant 192 : index
    %c0_62 = arith.constant 0 : index
    %183 = vector.load %arg3[%c192, %c0_62] : memref<352x128xf32, #tpu.memory_space<vmem>>, vector<32x32xf32>
    %c224 = arith.constant 224 : index
    %c0_63 = arith.constant 0 : index
    %184 = vector.load %arg3[%c224, %c0_63] : memref<352x128xf32, #tpu.memory_space<vmem>>, vector<32x64xf32>
    %c256 = arith.constant 256 : index
    %c0_64 = arith.constant 0 : index
    %185 = vector.load %arg3[%c256, %c0_64] : memref<352x128xf32, #tpu.memory_space<vmem>>, vector<64x32xf32>
    %cst_65 = arith.constant dense<0.000000e+00> : vector<16x96xf32>
    %186 = tpu.matmul %181, %182, %cst_65 {dimension_numbers = #tpu.dot_dimension_numbers<[1], [0], [0], [1], [0, 0, 1, 1], [], []>} : vector<16x32xf32>, vector<32x96xf32>, vector<16x96xf32> -> vector<16x96xf32>
    %c11 = arith.constant 11 : index
    %c0_66 = arith.constant 0 : index
    %187 = vector.load %arg4[%c11, %c0_66] : memref<19x128xf32, #tpu.memory_space<vmem>>, vector<1x96xf32>
    %188 = vector.broadcast %187 : vector<1x96xf32> to vector<16x96xf32>
    %189 = arith.addf %186, %188 : vector<16x96xf32>
    %190 = vector.extract_strided_slice %189 {offsets = [0, 0], sizes = [16, 8], strides = [1, 1]} : vector<16x96xf32> to vector<16x8xf32>
    %191 = vector.extract_strided_slice %189 {offsets = [0, 32], sizes = [16, 8], strides = [1, 1]} : vector<16x96xf32> to vector<16x8xf32>
    %192 = vector.extract_strided_slice %189 {offsets = [0, 64], sizes = [16, 8], strides = [1, 1]} : vector<16x96xf32> to vector<16x8xf32>
    %cst_67 = arith.constant dense<0.000000e+00> : vector<16x16xf32>
    %193 = tpu.matmul %190, %191, %cst_67 {dimension_numbers = #tpu.dot_dimension_numbers<[1], [1], [0], [0], [0, 0, 1, 0], [], []>} : vector<16x8xf32>, vector<16x8xf32>, vector<16x16xf32> -> vector<16x16xf32>
    %cst_68 = arith.constant 0.353553385 : f32
    %194 = vector.broadcast %cst_68 : f32 to vector<16x16xf32>
    %195 = arith.mulf %193, %194 : vector<16x16xf32>
    %196 = arith.addf %195, %25 : vector<16x16xf32>
    %cst_69 = arith.constant dense<0xFF800000> : vector<16xf32>
    %197 = vector.multi_reduction <maximumf>, %196, %cst_69 [1] : vector<16x16xf32> to vector<16xf32>
    %198 = vector.shape_cast %197 : vector<16xf32> to vector<16x1xf32>
    %199 = vector.broadcast %198 : vector<16x1xf32> to vector<16x16xf32>
    %200 = arith.subf %196, %199 : vector<16x16xf32>
    %201 = math.exp %200 : vector<16x16xf32>
    %cst_70 = arith.constant dense<0.000000e+00> : vector<16xf32>
    %202 = vector.multi_reduction <add>, %201, %cst_70 [1] : vector<16x16xf32> to vector<16xf32>
    %203 = vector.shape_cast %202 : vector<16xf32> to vector<16x1xf32>
    %204 = tpu.reciprocal %203 {approx = true} : vector<16x1xf32> -> vector<16x1xf32>
    %205 = vector.broadcast %204 : vector<16x1xf32> to vector<16x16xf32>
    %206 = arith.mulf %201, %205 : vector<16x16xf32>
    %cst_71 = arith.constant dense<0.000000e+00> : vector<16x8xf32>
    %207 = tpu.matmul %206, %192, %cst_71 {dimension_numbers = #tpu.dot_dimension_numbers<[1], [0], [0], [1], [0, 0, 1, 1], [], []>} : vector<16x16xf32>, vector<16x8xf32>, vector<16x8xf32> -> vector<16x8xf32>
    %208 = vector.extract_strided_slice %189 {offsets = [0, 8], sizes = [16, 8], strides = [1, 1]} : vector<16x96xf32> to vector<16x8xf32>
    %209 = vector.extract_strided_slice %189 {offsets = [0, 40], sizes = [16, 8], strides = [1, 1]} : vector<16x96xf32> to vector<16x8xf32>
    %210 = vector.extract_strided_slice %189 {offsets = [0, 72], sizes = [16, 8], strides = [1, 1]} : vector<16x96xf32> to vector<16x8xf32>
    %cst_72 = arith.constant dense<0.000000e+00> : vector<16x16xf32>
    %211 = tpu.matmul %208, %209, %cst_72 {dimension_numbers = #tpu.dot_dimension_numbers<[1], [1], [0], [0], [0, 0, 1, 0], [], []>} : vector<16x8xf32>, vector<16x8xf32>, vector<16x16xf32> -> vector<16x16xf32>
    %cst_73 = arith.constant 0.353553385 : f32
    %212 = vector.broadcast %cst_73 : f32 to vector<16x16xf32>
    %213 = arith.mulf %211, %212 : vector<16x16xf32>
    %214 = arith.addf %213, %25 : vector<16x16xf32>
    %cst_74 = arith.constant dense<0xFF800000> : vector<16xf32>
    %215 = vector.multi_reduction <maximumf>, %214, %cst_74 [1] : vector<16x16xf32> to vector<16xf32>
    %216 = vector.shape_cast %215 : vector<16xf32> to vector<16x1xf32>
    %217 = vector.broadcast %216 : vector<16x1xf32> to vector<16x16xf32>
    %218 = arith.subf %214, %217 : vector<16x16xf32>
    %219 = math.exp %218 : vector<16x16xf32>
    %cst_75 = arith.constant dense<0.000000e+00> : vector<16xf32>
    %220 = vector.multi_reduction <add>, %219, %cst_75 [1] : vector<16x16xf32> to vector<16xf32>
    %221 = vector.shape_cast %220 : vector<16xf32> to vector<16x1xf32>
    %222 = tpu.reciprocal %221 {approx = true} : vector<16x1xf32> -> vector<16x1xf32>
    %223 = vector.broadcast %222 : vector<16x1xf32> to vector<16x16xf32>
    %224 = arith.mulf %219, %223 : vector<16x16xf32>
    %cst_76 = arith.constant dense<0.000000e+00> : vector<16x8xf32>
    %225 = tpu.matmul %224, %210, %cst_76 {dimension_numbers = #tpu.dot_dimension_numbers<[1], [0], [0], [1], [0, 0, 1, 1], [], []>} : vector<16x16xf32>, vector<16x8xf32>, vector<16x8xf32> -> vector<16x8xf32>
    %226 = vector.extract_strided_slice %189 {offsets = [0, 16], sizes = [16, 8], strides = [1, 1]} : vector<16x96xf32> to vector<16x8xf32>
    %227 = vector.extract_strided_slice %189 {offsets = [0, 48], sizes = [16, 8], strides = [1, 1]} : vector<16x96xf32> to vector<16x8xf32>
    %228 = vector.extract_strided_slice %189 {offsets = [0, 80], sizes = [16, 8], strides = [1, 1]} : vector<16x96xf32> to vector<16x8xf32>
    %cst_77 = arith.constant dense<0.000000e+00> : vector<16x16xf32>
    %229 = tpu.matmul %226, %227, %cst_77 {dimension_numbers = #tpu.dot_dimension_numbers<[1], [1], [0], [0], [0, 0, 1, 0], [], []>} : vector<16x8xf32>, vector<16x8xf32>, vector<16x16xf32> -> vector<16x16xf32>
    %cst_78 = arith.constant 0.353553385 : f32
    %230 = vector.broadcast %cst_78 : f32 to vector<16x16xf32>
    %231 = arith.mulf %229, %230 : vector<16x16xf32>
    %232 = arith.addf %231, %25 : vector<16x16xf32>
    %cst_79 = arith.constant dense<0xFF800000> : vector<16xf32>
    %233 = vector.multi_reduction <maximumf>, %232, %cst_79 [1] : vector<16x16xf32> to vector<16xf32>
    %234 = vector.shape_cast %233 : vector<16xf32> to vector<16x1xf32>
    %235 = vector.broadcast %234 : vector<16x1xf32> to vector<16x16xf32>
    %236 = arith.subf %232, %235 : vector<16x16xf32>
    %237 = math.exp %236 : vector<16x16xf32>
    %cst_80 = arith.constant dense<0.000000e+00> : vector<16xf32>
    %238 = vector.multi_reduction <add>, %237, %cst_80 [1] : vector<16x16xf32> to vector<16xf32>
    %239 = vector.shape_cast %238 : vector<16xf32> to vector<16x1xf32>
    %240 = tpu.reciprocal %239 {approx = true} : vector<16x1xf32> -> vector<16x1xf32>
    %241 = vector.broadcast %240 : vector<16x1xf32> to vector<16x16xf32>
    %242 = arith.mulf %237, %241 : vector<16x16xf32>
    %cst_81 = arith.constant dense<0.000000e+00> : vector<16x8xf32>
    %243 = tpu.matmul %242, %228, %cst_81 {dimension_numbers = #tpu.dot_dimension_numbers<[1], [0], [0], [1], [0, 0, 1, 1], [], []>} : vector<16x16xf32>, vector<16x8xf32>, vector<16x8xf32> -> vector<16x8xf32>
    %244 = vector.extract_strided_slice %189 {offsets = [0, 24], sizes = [16, 8], strides = [1, 1]} : vector<16x96xf32> to vector<16x8xf32>
    %245 = vector.extract_strided_slice %189 {offsets = [0, 56], sizes = [16, 8], strides = [1, 1]} : vector<16x96xf32> to vector<16x8xf32>
    %246 = vector.extract_strided_slice %189 {offsets = [0, 88], sizes = [16, 8], strides = [1, 1]} : vector<16x96xf32> to vector<16x8xf32>
    %cst_82 = arith.constant dense<0.000000e+00> : vector<16x16xf32>
    %247 = tpu.matmul %244, %245, %cst_82 {dimension_numbers = #tpu.dot_dimension_numbers<[1], [1], [0], [0], [0, 0, 1, 0], [], []>} : vector<16x8xf32>, vector<16x8xf32>, vector<16x16xf32> -> vector<16x16xf32>
    %cst_83 = arith.constant 0.353553385 : f32
    %248 = vector.broadcast %cst_83 : f32 to vector<16x16xf32>
    %249 = arith.mulf %247, %248 : vector<16x16xf32>
    %250 = arith.addf %249, %25 : vector<16x16xf32>
    %cst_84 = arith.constant dense<0xFF800000> : vector<16xf32>
    %251 = vector.multi_reduction <maximumf>, %250, %cst_84 [1] : vector<16x16xf32> to vector<16xf32>
    %252 = vector.shape_cast %251 : vector<16xf32> to vector<16x1xf32>
    %253 = vector.broadcast %252 : vector<16x1xf32> to vector<16x16xf32>
    %254 = arith.subf %250, %253 : vector<16x16xf32>
    %255 = math.exp %254 : vector<16x16xf32>
    %cst_85 = arith.constant dense<0.000000e+00> : vector<16xf32>
    %256 = vector.multi_reduction <add>, %255, %cst_85 [1] : vector<16x16xf32> to vector<16xf32>
    %257 = vector.shape_cast %256 : vector<16xf32> to vector<16x1xf32>
    %258 = tpu.reciprocal %257 {approx = true} : vector<16x1xf32> -> vector<16x1xf32>
    %259 = vector.broadcast %258 : vector<16x1xf32> to vector<16x16xf32>
    %260 = arith.mulf %255, %259 : vector<16x16xf32>
    %cst_86 = arith.constant dense<0.000000e+00> : vector<16x8xf32>
    %261 = tpu.matmul %260, %246, %cst_86 {dimension_numbers = #tpu.dot_dimension_numbers<[1], [0], [0], [1], [0, 0, 1, 1], [], []>} : vector<16x16xf32>, vector<16x8xf32>, vector<16x8xf32> -> vector<16x8xf32>
    %262 = tpu.concatenate %207, %225, %243, %261 in 1 : vector<16x8xf32>, vector<16x8xf32>, vector<16x8xf32>, vector<16x8xf32> -> vector<16x32xf32>
    %cst_87 = arith.constant dense<0.000000e+00> : vector<16x32xf32>
    %263 = tpu.matmul %262, %183, %cst_87 {dimension_numbers = #tpu.dot_dimension_numbers<[1], [0], [0], [1], [0, 0, 1, 1], [], []>} : vector<16x32xf32>, vector<32x32xf32>, vector<16x32xf32> -> vector<16x32xf32>
    %c12 = arith.constant 12 : index
    %c0_88 = arith.constant 0 : index
    %264 = vector.load %arg4[%c12, %c0_88] : memref<19x128xf32, #tpu.memory_space<vmem>>, vector<1x32xf32>
    %265 = vector.broadcast %264 : vector<1x32xf32> to vector<16x32xf32>
    %266 = arith.addf %263, %265 : vector<16x32xf32>
    %267 = arith.addf %266, %181 : vector<16x32xf32>
    %c13 = arith.constant 13 : index
    %c0_89 = arith.constant 0 : index
    %268 = vector.load %arg4[%c13, %c0_89] : memref<19x128xf32, #tpu.memory_space<vmem>>, vector<1x32xf32>
    %c14 = arith.constant 14 : index
    %c0_90 = arith.constant 0 : index
    %269 = vector.load %arg4[%c14, %c0_90] : memref<19x128xf32, #tpu.memory_space<vmem>>, vector<1x32xf32>
    %cst_91 = arith.constant dense<0.000000e+00> : vector<16xf32>
    %270 = vector.multi_reduction <add>, %267, %cst_91 [1] : vector<16x32xf32> to vector<16xf32>
    %271 = vector.shape_cast %270 : vector<16xf32> to vector<16x1xf32>
    %cst_92 = arith.constant 3.200000e+01 : f32
    %272 = vector.broadcast %cst_92 : f32 to vector<16x1xf32>
    %273 = arith.divf %271, %272 : vector<16x1xf32>
    %274 = vector.broadcast %273 : vector<16x1xf32> to vector<16x32xf32>
    %275 = arith.subf %267, %274 : vector<16x32xf32>
    %276 = arith.mulf %275, %275 : vector<16x32xf32>
    %cst_93 = arith.constant dense<0.000000e+00> : vector<16xf32>
    %277 = vector.multi_reduction <add>, %276, %cst_93 [1] : vector<16x32xf32> to vector<16xf32>
    %278 = vector.shape_cast %277 : vector<16xf32> to vector<16x1xf32>
    %cst_94 = arith.constant 3.200000e+01 : f32
    %279 = vector.broadcast %cst_94 : f32 to vector<16x1xf32>
    %280 = arith.divf %278, %279 : vector<16x1xf32>
    %281 = vector.broadcast %273 : vector<16x1xf32> to vector<16x32xf32>
    %282 = arith.subf %267, %281 : vector<16x32xf32>
    %cst_95 = arith.constant 9.99999996E-13 : f32
    %283 = vector.broadcast %cst_95 : f32 to vector<16x1xf32>
    %284 = arith.addf %280, %283 : vector<16x1xf32>
    %285 = math.rsqrt %284 : vector<16x1xf32>
    %286 = vector.broadcast %285 : vector<16x1xf32> to vector<16x32xf32>
    %287 = arith.mulf %282, %286 : vector<16x32xf32>
    %288 = vector.broadcast %268 : vector<1x32xf32> to vector<16x32xf32>
    %289 = arith.mulf %287, %288 : vector<16x32xf32>
    %290 = vector.broadcast %269 : vector<1x32xf32> to vector<16x32xf32>
    %291 = arith.addf %289, %290 : vector<16x32xf32>
    %cst_96 = arith.constant dense<0.000000e+00> : vector<16x64xf32>
    %292 = tpu.matmul %291, %184, %cst_96 {dimension_numbers = #tpu.dot_dimension_numbers<[1], [0], [0], [1], [0, 0, 1, 1], [], []>} : vector<16x32xf32>, vector<32x64xf32>, vector<16x64xf32> -> vector<16x64xf32>
    %c15 = arith.constant 15 : index
    %c0_97 = arith.constant 0 : index
    %293 = vector.load %arg4[%c15, %c0_97] : memref<19x128xf32, #tpu.memory_space<vmem>>, vector<1x64xf32>
    %294 = vector.broadcast %293 : vector<1x64xf32> to vector<16x64xf32>
    %295 = arith.addf %292, %294 : vector<16x64xf32>
    %cst_98 = arith.constant 5.000000e-01 : f32
    %296 = vector.broadcast %cst_98 : f32 to vector<16x64xf32>
    %297 = arith.mulf %296, %295 : vector<16x64xf32>
    %cst_99 = arith.constant 4.471500e-02 : f32
    %298 = vector.broadcast %cst_99 : f32 to vector<16x64xf32>
    %299 = arith.mulf %298, %295 : vector<16x64xf32>
    %300 = arith.mulf %299, %295 : vector<16x64xf32>
    %301 = arith.mulf %300, %295 : vector<16x64xf32>
    %302 = arith.addf %295, %301 : vector<16x64xf32>
    %cst_100 = arith.constant 0.797884583 : f32
    %303 = vector.broadcast %cst_100 : f32 to vector<16x64xf32>
    %304 = arith.mulf %303, %302 : vector<16x64xf32>
    %305 = math.tanh %304 : vector<16x64xf32>
    %cst_101 = arith.constant 1.000000e+00 : f32
    %306 = vector.broadcast %cst_101 : f32 to vector<16x64xf32>
    %307 = arith.addf %306, %305 : vector<16x64xf32>
    %308 = arith.mulf %297, %307 : vector<16x64xf32>
    %cst_102 = arith.constant dense<0.000000e+00> : vector<16x32xf32>
    %309 = tpu.matmul %308, %185, %cst_102 {dimension_numbers = #tpu.dot_dimension_numbers<[1], [0], [0], [1], [0, 0, 1, 1], [], []>} : vector<16x64xf32>, vector<64x32xf32>, vector<16x32xf32> -> vector<16x32xf32>
    %c16 = arith.constant 16 : index
    %c0_103 = arith.constant 0 : index
    %310 = vector.load %arg4[%c16, %c0_103] : memref<19x128xf32, #tpu.memory_space<vmem>>, vector<1x32xf32>
    %311 = vector.broadcast %310 : vector<1x32xf32> to vector<16x32xf32>
    %312 = arith.addf %309, %311 : vector<16x32xf32>
    %313 = arith.addf %312, %291 : vector<16x32xf32>
    %c17 = arith.constant 17 : index
    %c0_104 = arith.constant 0 : index
    %314 = vector.load %arg4[%c17, %c0_104] : memref<19x128xf32, #tpu.memory_space<vmem>>, vector<1x32xf32>
    %c18 = arith.constant 18 : index
    %c0_105 = arith.constant 0 : index
    %315 = vector.load %arg4[%c18, %c0_105] : memref<19x128xf32, #tpu.memory_space<vmem>>, vector<1x32xf32>
    %cst_106 = arith.constant dense<0.000000e+00> : vector<16xf32>
    %316 = vector.multi_reduction <add>, %313, %cst_106 [1] : vector<16x32xf32> to vector<16xf32>
    %317 = vector.shape_cast %316 : vector<16xf32> to vector<16x1xf32>
    %cst_107 = arith.constant 3.200000e+01 : f32
    %318 = vector.broadcast %cst_107 : f32 to vector<16x1xf32>
    %319 = arith.divf %317, %318 : vector<16x1xf32>
    %320 = vector.broadcast %319 : vector<16x1xf32> to vector<16x32xf32>
    %321 = arith.subf %313, %320 : vector<16x32xf32>
    %322 = arith.mulf %321, %321 : vector<16x32xf32>
    %cst_108 = arith.constant dense<0.000000e+00> : vector<16xf32>
    %323 = vector.multi_reduction <add>, %322, %cst_108 [1] : vector<16x32xf32> to vector<16xf32>
    %324 = vector.shape_cast %323 : vector<16xf32> to vector<16x1xf32>
    %cst_109 = arith.constant 3.200000e+01 : f32
    %325 = vector.broadcast %cst_109 : f32 to vector<16x1xf32>
    %326 = arith.divf %324, %325 : vector<16x1xf32>
    %327 = vector.broadcast %319 : vector<16x1xf32> to vector<16x32xf32>
    %328 = arith.subf %313, %327 : vector<16x32xf32>
    %cst_110 = arith.constant 9.99999996E-13 : f32
    %329 = vector.broadcast %cst_110 : f32 to vector<16x1xf32>
    %330 = arith.addf %326, %329 : vector<16x1xf32>
    %331 = math.rsqrt %330 : vector<16x1xf32>
    %332 = vector.broadcast %331 : vector<16x1xf32> to vector<16x32xf32>
    %333 = arith.mulf %328, %332 : vector<16x32xf32>
    %334 = vector.broadcast %314 : vector<1x32xf32> to vector<16x32xf32>
    %335 = arith.mulf %333, %334 : vector<16x32xf32>
    %336 = vector.broadcast %315 : vector<1x32xf32> to vector<16x32xf32>
    %337 = arith.addf %335, %336 : vector<16x32xf32>
    %c320 = arith.constant 320 : index
    %c0_111 = arith.constant 0 : index
    %338 = vector.load %arg3[%c320, %c0_111] : memref<352x128xf32, #tpu.memory_space<vmem>>, vector<32x128xf32>
    %cst_112 = arith.constant dense<0.000000e+00> : vector<16x128xf32>
    %339 = tpu.matmul %337, %338, %cst_112 {dimension_numbers = #tpu.dot_dimension_numbers<[1], [0], [0], [1], [0, 0, 1, 1], [], []>} : vector<16x32xf32>, vector<32x128xf32>, vector<16x128xf32> -> vector<16x128xf32>
    %c2 = arith.constant 2 : index
    %c0_113 = arith.constant 0 : index
    %340 = vector.load %arg4[%c2, %c0_113] : memref<19x128xf32, #tpu.memory_space<vmem>>, vector<1x128xf32>
    %341 = vector.broadcast %340 : vector<1x128xf32> to vector<16x128xf32>
    %342 = arith.addf %339, %341 : vector<16x128xf32>
    %c0_114 = arith.constant 0 : index
    %c0_115 = arith.constant 0 : index
    %343 = vector.load %arg5[%c0_114, %c0_115] : memref<16x128xf32, #tpu.memory_space<vmem>>, vector<16x128xf32>
    tpu.vector_store %arg5[%c0_114, %c0_115], %342 {strides = array<i32>} : memref<16x128xf32, #tpu.memory_space<vmem>>, vector<16x128xf32>,
    return
  }
  func.func @transform_0(%arg0: i32) -> (i32, i32) {
    %c0_i32 = arith.constant 0 : i32
    %c0_i32_0 = arith.constant 0 : i32
    %c0_i32_1 = arith.constant 0 : i32
    return %c0_i32, %c0_i32_0 : i32, i32
  }
  func.func @transform_1(%arg0: i32) -> (i32, i32) {
    %c0_i32 = arith.constant 0 : i32
    %c0_i32_0 = arith.constant 0 : i32
    %c0_i32_1 = arith.constant 0 : i32
    return %c0_i32, %c0_i32_0 : i32, i32
  }
  func.func @transform_2(%arg0: i32) -> (i32, i32) {
    %c0_i32 = arith.constant 0 : i32
    %c0_i32_0 = arith.constant 0 : i32
    %c0_i32_1 = arith.constant 0 : i32
    return %c0_i32, %c0_i32_0 : i32, i32
  }
  func.func @transform_3(%arg0: i32) -> (i32, i32) {
    %c0_i32 = arith.constant 0 : i32
    %c0_i32_0 = arith.constant 0 : i32
    %c0_i32_1 = arith.constant 0 : i32
    return %c0_i32, %c0_i32_0 : i32, i32
  }
  func.func @transform_4(%arg0: i32) -> (i32, i32) {
    %c0_i32 = arith.constant 0 : i32
    %c0_i32_0 = arith.constant 0 : i32
    %c0_i32_1 = arith.constant 0 : i32
    return %c0_i32, %c0_i32_0 : i32, i32
  }
}

</mosaic_0001>

<bundles_post_ra>
// kernel: ner_forward.1
= control target key start
LH: loop header
LB: loop body
LE: loop exit
PB: predicated region body
PF: predicated region fallthrough
CT: control target
= control target key end

     0   :  { %vm21_vm0 = vcmask 261120   ;;  %vm175_vm1 = vcmask 64512   ;;  %s3577_s6 = smov 96   ;;  %s3578_s7 = smov 88   ;;  %vm263_vm3 = vcmask 130048   ;;  %vm1013_vm4 = vcmask 195584   ;;  %s4125_s0 = inlined_call_operand.vmem [shape: f32[16,32], index: 0, kind: input, shape index: {}]   ;;  %s4126_s2 = inlined_call_operand.vmem [shape: f32[352,128], index: 2, kind: input, shape index: {}]   ;;  %s4127_s3 = inlined_call_operand.vmem [shape: f32[19,128], index: 3, kind: input, shape index: {}]   ;;  %s4128_s1 = inlined_call_operand.vmem [shape: f32[16,16], index: 1, kind: input, shape index: {}]   ;;  %s4129_s4 = inlined_call_operand.vmem [shape: f32[16,128], index: 4, kind: output, shape index: {}]  }
   0x1   :  { %v17_v0 = vld [vmem:[%s4125_s0] sm:$0xff]  ;;  %v18_v1 = vld [vmem:[%s4125_s0 + $0x8] sm:$0xff]  ;;  %v65_v16 = vld [vmem:[%s4126_s2 + $0x10] sm:$0xff]  ;;  %s3579_s8 = smov 120   ;;  %s3580_s13 = smov 64   ;;  %vm1253_vm5 = vcmask 523264  }
   0x2   :  { %v22_v2 = vsel %vm21_vm0, %v17_v0, 0.0  ;;  %v25_v3 = vsel %vm21_vm0, %v18_v1, 0.0  ;;  %v63_v14 = vld [vmem:[%s4126_s2] sm:$0xff]  ;;  %v64_v15 = vld [vmem:[%s4126_s2 + $0x8] sm:$0xff]  ;;  %v66_v18 = vld [vmem:[%s4126_s2 + $0x18] sm:$0xff]  ;;  %s3581_s14 = smov 56  }
   0x3   :  { %23 = vadd.xlane.f32.xlu0 %v22_v2  ;;  %v3221_v17 = vpack.c.bf16 %v64_v15, %v63_v14  ;;  %v3225_v19 = vpack.c.bf16 %v66_v18, %v65_v16  ;;  %v2783_v27 = vld [vmem:[%s4127_s3] ss:$0 sm:$0xff]  ;;  %v2784_v29 = vld [vmem:[%s4127_s3 + $0x1] ss:$0 sm:$0xff]  ;;  %v2785_v36 = vld [vmem:[%s4127_s3 + $0x3] ss:$0 sm:$0xff] }
   0x4   :  { %vm3675_vm2 = vmpackc.low %vm175_vm1, %vm175_vm1  ;;  %v3688_v49 = vld [vmem:[%s4128_s1] sm:$0xff]  ;;  %v3693_v52 = vld [vmem:[%s4128_s1 + $0x8] sm:$0xff]  ;;  %s3582_s15 = smov 112   ;;  %s3583_s16 = smov 80  }
   0x5   :  { %3222 = vmatprep.subr.bf16.mxu0 %v3221_v17  ;;  %s3584_s17 = smov 48   ;;  %s3585_s18 = smov 104  }
   0x6   :  { %3224 = vmatpush3.bf16.msra.mxu0 %v3221_v17  ;;  %s3586_s0 = smov 72   ;;  %s3587_s19 = smov 40  }
   0x7   :  { %26 = vadd.xlane.f32.xlu0 %v25_v3  ;;  %3226 = vmatprep.subr.bf16.mxu0 %v3225_v19  ;;  %s3588_s20 = smov 8   ;;  %s3589_s21 = smov 16  }
   0x8   :  { %s3590_s30 = smov 24  }
   0xa   :  { %3228 = vmatpush3.bf16.msra.mxu0 %v3225_v19 }
  0x90   :  { %v24_v4 = vpop.xlane.xlu0 %23 }
  0x91   :  { %v29_v5 = vmul.f32 0.03125, %v24_v4 }
  0x93   :  { %v31_v6 = vsub.f32 %v17_v0, %v29_v5 }
  0x94   :  { %v27_v7 = vpop.xlane.xlu0 %26 }
  0x95   :  { %v30_v8 = vmul.f32 0.03125, %v27_v7  ;;  %v33_v9 = vmul.f32 %v31_v6, %v31_v6 }
  0x97   :  { %v32_v10 = vsub.f32 %v18_v1, %v30_v8  ;;  %v35_v11 = vsel %vm21_vm0, %v33_v9, 0.0 }
  0x98   :  { %36 = vadd.xlane.f32.xlu1 %v35_v11 }
  0x99   :  { %v34_v12 = vmul.f32 %v32_v10, %v32_v10 }
  0x9b   :  { %v38_v13 = vsel %vm21_vm0, %v34_v12, 0.0 }
  0x9c   :  { %39 = vadd.xlane.f32.xlu1 %v38_v13 }
 0x125   :  { %v37_v20 = vpop.xlane.xlu1 %36 }
 0x126   :  { %v41_v21 = vmul.f32 0.03125, %v37_v20 }
 0x128   :  { %v43_v22 = vadd.f32 1e-12, %v41_v21 }
 0x129   :  { %v40_v23 = vpop.xlane.xlu1 %39 }
 0x12a   :  { %3483 = vrsqrt.f32 %v43_v22  ;;  %v42_v24 = vmul.f32 0.03125, %v40_v23 }
 0x12c   :  { %v44_v25 = vadd.f32 1e-12, %v42_v24 }
 0x12e   :  { %3485 = vrsqrt.f32 %v44_v25 }
 0x134   :  { %v3484_v26 = vpop.eup %3483 }
 0x135   :  { %v47_v28 = vmul.f32 %v3484_v26, %v31_v6 }
 0x137   :  { %v53_v30 = vmul.f32 %v2783_v27, %v47_v28 }
 0x138   :  { %v3486_v31 = vpop.eup %3485 }
 0x139   :  { %v48_v32 = vmul.f32 %v3486_v31, %v32_v10  ;;  %v3644_v33 = vadd.f32 %v2784_v29, %v53_v30 }
 0x13b   :  { %v54_v34 = vmul.f32 %v2783_v27, %v48_v32  ;;  %3002 = vmatprep.mubr.msk.f32.mxu0 %vm21_vm0, %v3644_v33 }
 0x13d   :  { %v3648_v35 = vadd.f32 %v2784_v29, %v54_v34 }
 0x13f   :  { %3003 = vmatmul.mubr.msk.f32.vlgmr.msra.gmra.mrb[0].mxu0 %vm21_vm0, %v3648_v35 }
 0x212   :  { %v3004_v37 = vpop.f32.mrb[0].mxu0 }
 0x213   :  { %v3655_v38 = vadd.f32 %v3004_v37, %v2785_v36  ;;  %v160_v39 = vpop.f32.mrb[1].mxu0 }
 0x214   :  { %v3657_v40 = vadd.f32 %v2785_v36, %v160_v39 }
 0x216   :  { %3009 = vmatprep.mubr.msk.f32.mxu1 %vm175_vm1, %v3657_v40  ;;  %v3663_v41 = vpack.i.bf16 %v3655_v38, %v3657_v40 }
 0x218   :  { %3404 = vrot.lane.b32.xlu0 %v3663_v41, %s3577_s6 }
 0x21c   :  { %3414 = vrot.lane.b32.xlu0 %v3663_v41, %s3578_s7 }
 0x220   :  { %373 = vrot.lane.b32.xlu0 %v3657_v40, %s3579_s8 }
 0x224   :  { %375 = vrot.lane.b32.xlu0 %v3655_v38, %s3579_s8 }
 0x28a   :  { %v3405_v42 = vpop.permute.xlu0 %3404 }
 0x28b   :  { %v3407_v43 = vunpack.i.h.bf16 %v3405_v42  ;;  %v3406_v44 = vunpack.i.l.bf16 %v3405_v42 }
 0x28d   :  { %v3229_v46 = vpack.c.bf16 %v3407_v43, %v3406_v44 }
 0x28e   :  { %v3415_v5 = vpop.permute.xlu0 %3414 }
 0x28f   :  { %3231 = vmatprep.subr.msk.bf16.mxu1 %vm3675_vm2, %v3229_v46  ;;  %v3417_v7 = vunpack.i.h.bf16 %v3415_v5  ;;  %v3416_v8 = vunpack.i.l.bf16 %v3415_v5 }
 0x290   :  { %3234 = vmatpush3.bf16.xpose.msk.msra.mxu1 %vm3675_vm2, %v3229_v46 }
 0x291   :  { %v3239_v12 = vpack.c.bf16 %v3417_v7, %v3416_v8 }
 0x292   :  { %v374_v17 = vpop.permute.xlu0 %373 }
 0x296   :  { %v376_v18 = vpop.permute.xlu0 %375 }
 0x297   :  { %3010 = vmatmul.mubr.msk.f32.vlgmr.msra.gmra.mrb[0].mxu1 %vm175_vm1, %v3655_v38 }
 0x36a   :  { %v3011_v47 = vpop.f32.mrb[0].mxu1 }
 0x36b   :  { %v250_v48 = vpop.f32.mrb[1].mxu1  ;;  %v260_v50 = vmul.f32 0.35355338, %v3011_v47 }
 0x36c   :  { %v259_v51 = vmul.f32 0.35355338, %v250_v48 }
 0x36d   :  { %v262_v55 = vadd.f32 %v260_v50, %v3693_v52 }
 0x36e   :  { %v261_v53 = vadd.f32 %v259_v51, %v3688_v49 }
 0x36f   :  { %v267_v56 = vsel %vm263_vm3, %v262_v55, -inf }
 0x370   :  { %v264_v54 = vsel %vm263_vm3, %v261_v53, -inf }
 0x371   :  { %265 = vmax.xlane.f32.xlu1 %v264_v54 }
 0x375   :  { %268 = vmax.xlane.f32.xlu1 %v267_v56 }
 0x3fe   :  { %v266_v57 = vpop.xlane.xlu1 %265 }
 0x3ff   :  { %v270_v58 = vsub.f32 %v261_v53, %v266_v57 }
 0x401   :  { %v272_v61 = vmul.f32 1.442695, %v270_v58 }
 0x402   :  { %v269_v59 = vpop.xlane.xlu1 %268 }
 0x403   :  { %v271_v60 = vsub.f32 %v262_v55, %v269_v59 }
 0x405   :  { %v274_v62 = vmul.f32 1.442695, %v271_v60 }
 0x407   :  { %3487 = vpow2.f32 %v274_v62 }
 0x408   :  { %3489 = vpow2.f32 %v272_v61 }
 0x411   :  { %v3488_v63 = vpop.eup %3487 }
 0x412   :  { %v279_v0 = vsel %vm263_vm3, %v3488_v63, 0.0  ;;  %v3490_v1 = vpop.eup %3489 }
 0x413   :  { %280 = vadd.xlane.f32.xlu1 %v279_v0  ;;  %v276_v2 = vsel %vm263_vm3, %v3490_v1, 0.0 }
 0x417   :  { %277 = vadd.xlane.f32.xlu1 %v276_v2 }
 0x428   :  { %3409 = vrot.lane.b32.xlu1 %v3663_v41, %s3580_s13 }
 0x4a0   :  { %v281_v3 = vpop.xlane.xlu1 %280 }
 0x4a1   :  { %3491 = vrcp.f32 %v281_v3 }
 0x4a4   :  { %v278_v4 = vpop.xlane.xlu1 %277 }
 0x4a5   :  { %3493 = vrcp.f32 %v278_v4 }
 0x4a8   :  { %v3410_v6 = vpop.permute.xlu1 %3409 }
 0x4a9   :  { %v3412_v9 = vunpack.i.h.bf16 %v3410_v6  ;;  %v3411_v10 = vunpack.i.l.bf16 %v3410_v6 }
 0x4ab   :  { %v3235_v11 = vpack.c.bf16 %v3412_v9, %v3411_v10  ;;  %v3492_v13 = vpop.eup %3491 }
 0x4ac   :  { %v285_v16 = vmul.f32 %v3492_v13, %v3488_v63 }
 0x4ad   :  { %3236 = vmatprep.subr.bf16.mxu1 %v3235_v11 }
 0x4ae   :  { %3238 = vmatpush3.bf16.msra.mxu1 %v3235_v11 }
 0x4af   :  { %v3494_v14 = vpop.eup %3493  ;;  %3241 = vmatprep.subr.msk.bf16.mxu1 %vm3675_vm2, %v3239_v12 }
 0x4b0   :  { %v284_v15 = vmul.f32 %v3494_v14, %v3490_v1 }
 0x4b2   :  { %3016 = vmatprep.mubr.msk.f32.mxu1 %vm263_vm3, %v284_v15 }
 0x4b3   :  { %3017 = vmatmul.mubr.msk.f32.vlgmr.msra.gmra.mrb[2].mxu1 %vm263_vm3, %v285_v16 }
 0x4b4   :  { %3023 = vmatprep.mubr.msk.f32.mxu1 %vm175_vm1, %v374_v17 }
 0x4b7   :  { %3244 = vmatpush3.bf16.xpose.msk.msra.mxu1 %vm3675_vm2, %v3239_v12 }
 0x4be   :  { %3024 = vmatmul.mubr.msk.f32.vlgmr.msra.gmra.mrb[4].mxu1 %vm175_vm1, %v376_v18 }
 0x586   :  { %v3711_v19 = vpop.f32.mrb[2].mxu1 }
 0x587   :  { %v3713_v20 = vpop.f32.mrb[3].mxu1 }
 0x591   :  { %v3025_v21 = vpop.f32.mrb[4].mxu1 }
 0x592   :  { %v465_v22 = vmul.f32 0.35355338, %v3025_v21  ;;  %v455_v23 = vpop.f32.mrb[5].mxu1 }
 0x593   :  { %v464_v24 = vmul.f32 0.35355338, %v455_v23 }
 0x594   :  { %v467_v25 = vadd.f32 %v465_v22, %v3693_v52 }
 0x595   :  { %v466_v26 = vadd.f32 %v464_v24, %v3688_v49 }
 0x596   :  { %v471_v27 = vsel %vm263_vm3, %v467_v25, -inf }
 0x597   :  { %472 = vmax.xlane.f32.xlu0 %v471_v27  ;;  %v468_v28 = vsel %vm263_vm3, %v466_v26, -inf }
 0x598   :  { %469 = vmax.xlane.f32.xlu1 %v468_v28 }
 0x5a9   :  { %3419 = vrot.lane.b32.xlu1 %v3663_v41, %s3581_s14 }
 0x5ad   :  { %577 = vrot.lane.b32.xlu1 %v3657_v40, %s3582_s15 }
 0x5b1   :  { %579 = vrot.lane.b32.xlu1 %v3655_v38, %s3582_s15 }
 0x624   :  { %v473_v29 = vpop.xlane.xlu0 %472 }
 0x625   :  { %v475_v30 = vsub.f32 %v467_v25, %v473_v29  ;;  %v470_v31 = vpop.xlane.xlu1 %469 }
 0x626   :  { %v474_v32 = vsub.f32 %v466_v26, %v470_v31 }
 0x627   :  { %v478_v34 = vmul.f32 1.442695, %v475_v30 }
 0x628   :  { %v476_v36 = vmul.f32 1.442695, %v474_v32 }
 0x629   :  { %3495 = vpow2.f32 %v478_v34  ;;  %v3420_v37 = vpop.permute.xlu1 %3419 }
 0x62a   :  { %v3422_v39 = vunpack.i.h.bf16 %v3420_v37  ;;  %v3421_v42 = vunpack.i.l.bf16 %v3420_v37  ;;  %3497 = vpow2.f32 %v476_v36 }
 0x62c   :  { %v3245_v43 = vpack.c.bf16 %v3422_v39, %v3421_v42 }
 0x62d   :  { %v578_v61 = vpop.permute.xlu1 %577 }
 0x62e   :  { %3246 = vmatprep.subr.bf16.mxu0 %v3245_v43 }
 0x62f   :  { %3248 = vmatpush3.bf16.msra.mxu0 %v3245_v43 }
 0x631   :  { %v580_v62 = vpop.permute.xlu1 %579 }
 0x633   :  { %v3496_v44 = vpop.eup %3495 }
 0x634   :  { %v483_v46 = vsel %vm263_vm3, %v3496_v44, 0.0  ;;  %v3498_v47 = vpop.eup %3497 }
 0x635   :  { %484 = vadd.xlane.f32.xlu0 %v483_v46  ;;  %v480_v48 = vsel %vm263_vm3, %v3498_v47, 0.0 }
 0x639   :  { %481 = vadd.xlane.f32.xlu0 %v480_v48 }
 0x64f   :  { %3424 = vrot.lane.b32.xlu0 %v3663_v41, %s3583_s16 }
 0x6c2   :  { %v485_v50 = vpop.xlane.xlu0 %484 }
 0x6c3   :  { %3499 = vrcp.f32 %v485_v50 }
 0x6c6   :  { %v482_v51 = vpop.xlane.xlu0 %481 }
 0x6c7   :  { %3501 = vrcp.f32 %v482_v51 }
 0x6ca   :  { %v3425_v53 = vpop.permute.xlu0 %3424 }
 0x6cb   :  { %v3427_v54 = vunpack.i.h.bf16 %v3425_v53  ;;  %v3426_v55 = vunpack.i.l.bf16 %v3425_v53 }
 0x6cd   :  { %v3249_v56 = vpack.c.bf16 %v3427_v54, %v3426_v55  ;;  %v3500_v57 = vpop.eup %3499 }
 0x6ce   :  { %v489_v60 = vmul.f32 %v3500_v57, %v3496_v44 }
 0x6cf   :  { %3251 = vmatprep.subr.msk.bf16.mxu0 %vm3675_vm2, %v3249_v56 }
 0x6d1   :  { %v3502_v58 = vpop.eup %3501 }
 0x6d2   :  { %v488_v59 = vmul.f32 %v3502_v58, %v3498_v47 }
 0x6d4   :  { %3030 = vmatprep.mubr.msk.f32.mxu0 %vm263_vm3, %v488_v59 }
 0x6d5   :  { %3031 = vmatmul.mubr.msk.f32.vlgmr.msra.gmra.mrb[2].mxu0 %vm263_vm3, %v489_v60 }
 0x6d6   :  { %3254 = vmatpush3.bf16.xpose.msk.msra.mxu0 %vm3675_vm2, %v3249_v56  ;;  %3037 = vmatprep.mubr.msk.f32.mxu0 %vm175_vm1, %v578_v61 }
 0x6dd   :  { %3038 = vmatmul.mubr.msk.f32.vlgmr.msra.gmra.mrb[4].mxu0 %vm175_vm1, %v580_v62 }
 0x7a8   :  { %v3737_v63 = vpop.f32.mrb[2].mxu0 }
 0x7a9   :  { %v3739_v0 = vpop.f32.mrb[3].mxu0 }
 0x7b0   :  { %v3039_v1 = vpop.f32.mrb[4].mxu0 }
 0x7b1   :  { %v669_v2 = vmul.f32 0.35355338, %v3039_v1  ;;  %v659_v3 = vpop.f32.mrb[5].mxu0 }
 0x7b2   :  { %v668_v4 = vmul.f32 0.35355338, %v659_v3 }
 0x7b3   :  { %v671_v5 = vadd.f32 %v669_v2, %v3693_v52 }
 0x7b4   :  { %v670_v6 = vadd.f32 %v668_v4, %v3688_v49 }
 0x7b5   :  { %v675_v7 = vsel %vm263_vm3, %v671_v5, -inf }
 0x7b6   :  { %676 = vmax.xlane.f32.xlu0 %v675_v7  ;;  %v672_v8 = vsel %vm263_vm3, %v670_v6, -inf }
 0x7b7   :  { %673 = vmax.xlane.f32.xlu1 %v672_v8 }
 0x7c8   :  { %3429 = vrot.lane.b32.xlu1 %v3663_v41, %s3584_s17 }
 0x7cc   :  { %781 = vrot.lane.b32.xlu1 %v3657_v40, %s3585_s18 }
 0x7d0   :  { %783 = vrot.lane.b32.xlu1 %v3655_v38, %s3585_s18 }
 0x843   :  { %v677_v9 = vpop.xlane.xlu0 %676 }
 0x844   :  { %v679_v10 = vsub.f32 %v671_v5, %v677_v9  ;;  %v674_v11 = vpop.xlane.xlu1 %673  ;;  %v67_v9 = vld [vmem:[%s4126_s2 + $0x20] sm:$0xff] }
 0x845   :  { %v678_v12 = vsub.f32 %v670_v6, %v674_v11 }
 0x846   :  { %v682_v13 = vmul.f32 1.442695, %v679_v10  ;;  %v69_v10 = vld [vmem:[%s4126_s2 + $0x30] sm:$0xff] }
 0x847   :  { %v680_v14 = vmul.f32 1.442695, %v678_v12  ;;  %v70_v12 = vld [vmem:[%s4126_s2 + $0x38] sm:$0xff] }
 0x848   :  { %3503 = vpow2.f32 %v682_v13  ;;  %v3430_v15 = vpop.permute.xlu1 %3429  ;;  %v3273_v13 = vpack.c.bf16 %v70_v12, %v69_v10  ;;  %v78_v12 = vld [vmem:[%s4126_s2 + $0x78] sm:$0xff] }
 0x849   :  { %v3432_v16 = vunpack.i.h.bf16 %v3430_v15  ;;  %v3431_v17 = vunpack.i.l.bf16 %v3430_v15  ;;  %3505 = vpow2.f32 %v680_v14 }
 0x84b   :  { %v3255_v18 = vpack.c.bf16 %v3432_v16, %v3431_v17 }
 0x84c   :  { %v782_v34 = vpop.permute.xlu1 %781 }
 0x84d   :  { %3256 = vmatprep.subr.bf16.mxu1 %v3255_v18 }
 0x84e   :  { %3258 = vmatpush3.bf16.msra.mxu1 %v3255_v18 }
 0x850   :  { %v784_v36 = vpop.permute.xlu1 %783 }
 0x852   :  { %v3504_v21 = vpop.eup %3503 }
 0x853   :  { %v687_v40 = vsel %vm263_vm3, %v3504_v21, 0.0  ;;  %v3506_v22 = vpop.eup %3505 }
 0x854   :  { %688 = vadd.xlane.f32.xlu0 %v687_v40  ;;  %v684_v38 = vsel %vm263_vm3, %v3506_v22, 0.0 }
 0x858   :  { %685 = vadd.xlane.f32.xlu0 %v684_v38 }
 0x86e   :  { %3434 = vrot.lane.b32.xlu0 %v3663_v41, %s3586_s0 }
 0x8e1   :  { %v689_v23 = vpop.xlane.xlu0 %688 }
 0x8e2   :  { %3507 = vrcp.f32 %v689_v23 }
 0x8e5   :  { %v686_v24 = vpop.xlane.xlu0 %685 }
 0x8e6   :  { %3509 = vrcp.f32 %v686_v24 }
 0x8e9   :  { %v3435_v25 = vpop.permute.xlu0 %3434 }
 0x8ea   :  { %v3437_v26 = vunpack.i.h.bf16 %v3435_v25  ;;  %v3436_v27 = vunpack.i.l.bf16 %v3435_v25 }
 0x8ec   :  { %v3259_v28 = vpack.c.bf16 %v3437_v26, %v3436_v27  ;;  %v3508_v29 = vpop.eup %3507 }
 0x8ed   :  { %v693_v32 = vmul.f32 %v3508_v29, %v3504_v21 }
 0x8ee   :  { %3261 = vmatprep.subr.msk.bf16.mxu1 %vm3675_vm2, %v3259_v28 }
 0x8f0   :  { %v3510_v30 = vpop.eup %3509 }
 0x8f1   :  { %v692_v31 = vmul.f32 %v3510_v30, %v3506_v22 }
 0x8f3   :  { %3044 = vmatprep.mubr.msk.f32.mxu1 %vm263_vm3, %v692_v31 }
 0x8f4   :  { %3045 = vmatmul.mubr.msk.f32.vlgmr.msra.gmra.mrb[6].mxu1 %vm263_vm3, %v693_v32 }
 0x8f5   :  { %3264 = vmatpush3.bf16.xpose.msk.msra.mxu1 %vm3675_vm2, %v3259_v28  ;;  %3051 = vmatprep.mubr.msk.f32.mxu1 %vm175_vm1, %v782_v34 }
 0x8fc   :  { %3052 = vmatmul.mubr.msk.f32.vlgmr.msra.gmra.mrb[8].mxu1 %vm175_vm1, %v784_v36 }
 0x9c7   :  { %v3046_v37 = vpop.f32.mrb[6].mxu1 }
 0x9c8   :  { %v772_v39 = vpop.f32.mrb[7].mxu1 }
 0x9cf   :  { %v3053_v42 = vpop.f32.mrb[8].mxu1 }
 0x9d0   :  { %v873_v43 = vmul.f32 0.35355338, %v3053_v42  ;;  %v863_v44 = vpop.f32.mrb[9].mxu1 }
 0x9d1   :  { %v872_v46 = vmul.f32 0.35355338, %v863_v44 }
 0x9d2   :  { %v875_v47 = vadd.f32 %v873_v43, %v3693_v52 }
 0x9d3   :  { %v874_v48 = vadd.f32 %v872_v46, %v3688_v49 }
 0x9d4   :  { %v879_v50 = vsel %vm263_vm3, %v875_v47, -inf }
 0x9d5   :  { %880 = vmax.xlane.f32.xlu0 %v879_v50  ;;  %v876_v51 = vsel %vm263_vm3, %v874_v48, -inf }
 0x9d6   :  { %877 = vmax.xlane.f32.xlu1 %v876_v51  ;;  %v72_v51 = vld [vmem:[%s4126_s2 + $0x48] sm:$0xff] }
 0x9e7   :  { %3439 = vrot.lane.b32.xlu1 %v3663_v41, %s3587_s19 }
 0x9eb   :  { %989 = vrot.lane.b32.xlu1 %v3737_v63, %s3588_s20 }
 0x9ef   :  { %995 = vrot.lane.b32.xlu1 %v772_v39, %s3589_s21 }
 0x9f3   :  { %997 = vrot.lane.b32.xlu1 %v3046_v37, %s3589_s21 }
 0xa62   :  { %v881_v53 = vpop.xlane.xlu0 %880 }
 0xa63   :  { %v883_v54 = vsub.f32 %v875_v47, %v881_v53  ;;  %v878_v55 = vpop.xlane.xlu1 %877 }
 0xa64   :  { %v882_v56 = vsub.f32 %v874_v48, %v878_v55  ;;  %v74_v55 = vld [vmem:[%s4126_s2 + $0x58] sm:$0xff] }
 0xa65   :  { %v886_v57 = vmul.f32 1.442695, %v883_v54  ;;  %v73_v54 = vld [vmem:[%s4126_s2 + $0x50] sm:$0xff] }
 0xa66   :  { %v884_v58 = vmul.f32 1.442695, %v882_v56  ;;  %v3281_v56 = vpack.c.bf16 %v74_v55, %v73_v54 }
 0xa67   :  { %v3440_v59 = vpop.permute.xlu1 %3439 }
 0xa68   :  { %3511 = vpow2.f32 %v884_v58  ;;  %v3442_v60 = vunpack.i.h.bf16 %v3440_v59  ;;  %v3441_v61 = vunpack.i.l.bf16 %v3440_v59 }
 0xa69   :  { %3513 = vpow2.f32 %v886_v57 }
 0xa6a   :  { %v3265_v41 = vpack.c.bf16 %v3442_v60, %v3441_v61 }
 0xa6b   :  { %v990_v16 = vpop.permute.xlu1 %989 }
 0xa6c   :  { %3266 = vmatprep.subr.bf16.mxu0 %v3265_v41  ;;  %v1010_v38 = vsel %vm175_vm1, %v3711_v19, %v990_v16 }
 0xa6d   :  { %3268 = vmatpush3.bf16.msra.mxu0 %v3265_v41 }
 0xa6f   :  { %v996_v17 = vpop.permute.xlu1 %995 }
 0xa72   :  { %v3512_v62 = vpop.eup %3511 }
 0xa73   :  { %v888_v63 = vsel %vm263_vm3, %v3512_v62, 0.0  ;;  %v3514_v1 = vpop.eup %3513  ;;  %v998_v21 = vpop.permute.xlu1 %997 }
 0xa74   :  { %889 = vadd.xlane.f32.xlu0 %v888_v63  ;;  %v891_v2 = vsel %vm263_vm3, %v3514_v1, 0.0  ;;  %v1012_v25 = vsel %vm263_vm3, %v1010_v38, %v998_v21  ;;  %v2815_v63 = vld [vmem:[%s4127_s3 + $0x5] ss:$0 sm:$0xff] }
 0xa78   :  { %892 = vadd.xlane.f32.xlu0 %v891_v2  ;;  %v2816_v2 = vld [vmem:[%s4127_s3 + $0x6] ss:$0 sm:$0xff] }
 0xa8e   :  { %987 = vrot.lane.b32.xlu0 %v3739_v0, %s3588_s20  ;;  %v68_v0 = vld [vmem:[%s4126_s2 + $0x28] sm:$0xff] }
 0xa8f   :  { %v3269_v11 = vpack.c.bf16 %v68_v0, %v67_v9  ;;  %v75_v9 = vld [vmem:[%s4126_s2 + $0x60] sm:$0xff]  ;;  %v76_v0 = vld [vmem:[%s4126_s2 + $0x68] sm:$0xff] }
 0xa90   :  { %v3285_v10 = vpack.c.bf16 %v76_v0, %v75_v9 }
 0xa91   :  { %3270 = vmatprep.subr.bf16.mxu0 %v3269_v11 }
 0xb01   :  { %v890_v3 = vpop.xlane.xlu0 %889 }
 0xb02   :  { %3515 = vrcp.f32 %v890_v3 }
 0xb05   :  { %v893_v4 = vpop.xlane.xlu0 %892 }
 0xb06   :  { %3517 = vrcp.f32 %v893_v4 }
 0xb09   :  { %v988_v18 = vpop.permute.xlu0 %987 }
 0xb0a   :  { %v1009_v40 = vsel %vm175_vm1, %v3713_v20, %v988_v18  ;;  %v2812_v20 = vld [vmem:[%s4127_s3 + $0x4] ss:$0 sm:$0xff]  ;;  %v82_v18 = vld [vmem:[%s4126_s2 + $0x98] sm:$0xff] }
 0xb0b   :  { %v1011_v23 = vsel %vm263_vm3, %v1009_v40, %v996_v17  ;;  %v81_v17 = vld [vmem:[%s4126_s2 + $0x90] sm:$0xff]  ;;  %v2817_v40 = vld [vmem:[%s4127_s3 + $0x7] ss:$0 sm:$0xff] }
 0xb0c   :  { %v3516_v5 = vpop.eup %3515  ;;  %v3297_v21 = vpack.c.bf16 %v82_v18, %v81_v17  ;;  %v2824_v18 = vld [vmem:[%s4127_s3 + $0xa] ss:$0 sm:$0xff] }
 0xb0d   :  { %v896_v6 = vmul.f32 %v3516_v5, %v3512_v62 }
 0xb0f   :  { %3058 = vmatprep.mubr.msk.f32.mxu0 %vm263_vm3, %v896_v6 }
 0xb10   :  { %v3518_v7 = vpop.eup %3517 }
 0xb11   :  { %v897_v8 = vmul.f32 %v3518_v7, %v3514_v1 }
 0xb13   :  { %3059 = vmatmul.mubr.msk.f32.vlgmr.msra.gmra.mrb[6].mxu0 %vm263_vm3, %v897_v8 }
 0xb14   :  { %3272 = vmatpush3.bf16.msra.mxu0 %v3269_v11  ;;  %v77_v11 = vld [vmem:[%s4126_s2 + $0x70] sm:$0xff] }
 0xb15   :  { %3274 = vmatprep.subr.bf16.mxu0 %v3273_v13 }
 0xb18   :  { %3276 = vmatpush3.bf16.msra.mxu0 %v3273_v13  ;;  %v79_v13 = vld [vmem:[%s4126_s2 + $0x80] sm:$0xff] }
 0xb19   :  { %3286 = vmatprep.subr.bf16.mxu0 %v3285_v10 }
 0xbe6   :  { %v3060_v14 = vpop.f32.mrb[6].mxu0 }
 0xbe7   :  { %1005 = vrot.lane.b32.xlu1 %v3060_v14, %s3590_s30  ;;  %v976_v15 = vpop.f32.mrb[7].mxu0  ;;  %v3289_v14 = vpack.c.bf16 %v78_v12, %v77_v11 }
 0xbe8   :  { %1003 = vrot.lane.b32.xlu0 %v976_v15, %s3590_s30  ;;  %v80_v15 = vld [vmem:[%s4126_s2 + $0x88] sm:$0xff] }
 0xbe9   :  { %v3293_v16 = vpack.c.bf16 %v80_v15, %v79_v13 }
 0xc59   :  { %v1006_v22 = vpop.permute.xlu1 %1005 }
 0xc5a   :  { %v1004_v24 = vpop.permute.xlu0 %1003  ;;  %v1015_v27 = vsel %vm1013_vm4, %v1012_v25, %v1006_v22 }
 0xc5b   :  { %v1014_v26 = vsel %vm1013_vm4, %v1011_v23, %v1004_v24 }
 0xc5c   :  { %3069 = vmatprep.mubr.msk.f32.mxu0 %vm21_vm0, %v1014_v26 }
 0xc5d   :  { %3070 = vmatmul.mubr.msk.f32.vlgmr.msra.gmra.mrb[8].mxu0 %vm21_vm0, %v1015_v27 }
 0xc5e   :  { %3288 = vmatpush3.bf16.msra.mxu0 %v3285_v10 }
 0xc5f   :  { %3290 = vmatprep.subr.bf16.mxu0 %v3289_v14 }
 0xc62   :  { %3292 = vmatpush3.bf16.msra.mxu0 %v3289_v14  ;;  %v2823_v14 = vld [vmem:[%s4127_s3 + $0x9] ss:$0 sm:$0xff] }
 0xc63   :  { %3294 = vmatprep.subr.bf16.mxu0 %v3293_v16 }
 0xc66   :  { %3296 = vmatpush3.bf16.msra.mxu0 %v3293_v16 }
 0xc67   :  { %3298 = vmatprep.subr.bf16.mxu0 %v3297_v21 }
 0xc6a   :  { %3300 = vmatpush3.bf16.msra.mxu0 %v3297_v21 }
 0xd30   :  { %v3071_v28 = vpop.f32.mrb[8].mxu0 }
 0xd31   :  { %v1099_v29 = vadd.f32 %v3071_v28, %v2812_v20  ;;  %v1093_v19 = vpop.f32.mrb[9].mxu0 }
 0xd32   :  { %v1094_v30 = vadd.f32 %v2812_v20, %v1093_v19 }
 0xd33   :  { %v1103_v31 = vadd.f32 %v1099_v29, %v3648_v35 }
 0xd34   :  { %v1102_v32 = vadd.f32 %v1094_v30, %v3644_v33  ;;  %v71_v33 = vld [vmem:[%s4126_s2 + $0x40] sm:$0xff] }
 0xd35   :  { %v1109_v34 = vsel %vm21_vm0, %v1103_v31, 0.0  ;;  %v3277_v53 = vpack.c.bf16 %v72_v51, %v71_v33 }
 0xd36   :  { %1110 = vadd.xlane.f32.xlu1 %v1109_v34  ;;  %v1106_v36 = vsel %vm21_vm0, %v1102_v32, 0.0 }
 0xd37   :  { %1107 = vadd.xlane.f32.xlu0 %v1106_v36  ;;  %3278 = vmatprep.subr.bf16.mxu1 %v3277_v53 }
 0xd38   :  { %3280 = vmatpush3.bf16.msra.mxu1 %v3277_v53 }
 0xd39   :  { %3282 = vmatprep.subr.bf16.mxu1 %v3281_v56 }
 0xd3c   :  { %3284 = vmatpush3.bf16.msra.mxu1 %v3281_v56 }
 0xdc3   :  { %v1111_v37 = vpop.xlane.xlu1 %1110 }
 0xdc4   :  { %v1113_v39 = vmul.f32 0.03125, %v1111_v37  ;;  %v1108_v42 = vpop.xlane.xlu0 %1107 }
 0xdc5   :  { %v1112_v43 = vmul.f32 0.03125, %v1108_v42 }
 0xdc6   :  { %v1115_v44 = vsub.f32 %v1103_v31, %v1113_v39 }
 0xdc7   :  { %v1114_v46 = vsub.f32 %v1102_v32, %v1112_v43 }
 0xdc8   :  { %v1117_v50 = vmul.f32 %v1115_v44, %v1115_v44 }
 0xdc9   :  { %v1116_v47 = vmul.f32 %v1114_v46, %v1114_v46 }
 0xdca   :  { %v1121_v35 = vsel %vm21_vm0, %v1117_v50, 0.0 }
 0xdcb   :  { %v1118_v48 = vsel %vm21_vm0, %v1116_v47, 0.0  ;;  %v2820_v47 = vld [vmem:[%s4127_s3 + $0x8] ss:$0 sm:$0xff] }
 0xdcc   :  { %1119 = vadd.xlane.f32.xlu0 %v1118_v48 }
 0xdd0   :  { %1122 = vadd.xlane.f32.xlu0 %v1121_v35 }
 0xe59   :  { %v1120_v57 = vpop.xlane.xlu0 %1119 }
 0xe5a   :  { %v1124_v58 = vmul.f32 0.03125, %v1120_v57 }
 0xe5c   :  { %v1126_v59 = vadd.f32 1e-12, %v1124_v58 }
 0xe5d   :  { %v1123_v60 = vpop.xlane.xlu0 %1122 }
 0xe5e   :  { %3519 = vrsqrt.f32 %v1126_v59  ;;  %v1125_v61 = vmul.f32 0.03125, %v1123_v60 }
 0xe60   :  { %v1127_v41 = vadd.f32 1e-12, %v1125_v61 }
 0xe62   :  { %3521 = vrsqrt.f32 %v1127_v41 }
 0xe68   :  { %v3520_v62 = vpop.eup %3519 }
 0xe69   :  { %v1130_v1 = vmul.f32 %v3520_v62, %v1114_v46 }
 0xe6b   :  { %v1136_v3 = vmul.f32 %v2815_v63, %v1130_v1 }
 0xe6c   :  { %v3522_v4 = vpop.eup %3521 }
 0xe6d   :  { %v1131_v5 = vmul.f32 %v3522_v4, %v1115_v44  ;;  %v1142_v6 = vadd.f32 %v2816_v2, %v1136_v3  ;;  %v1378_v3 = vld [vmem:[%s4126_s2 + $0xa8] sm:$0xff] }
 0xe6f   :  { %v1137_v7 = vmul.f32 %v2815_v63, %v1131_v5  ;;  %3080 = vmatprep.mubr.msk.f32.mxu1 %vm21_vm0, %v1142_v6  ;;  %v1379_v5 = vld [vmem:[%s4126_s2 + $0xb0] sm:$0xff] }
 0xe71   :  { %v1143_v8 = vadd.f32 %v2816_v2, %v1137_v7  ;;  %v1377_v2 = vld [vmem:[%s4126_s2 + $0xa0] sm:$0xff] }
 0xe72   :  { %v3301_v4 = vpack.c.bf16 %v1378_v3, %v1377_v2 }
 0xe73   :  { %3081 = vmatmul.mubr.msk.f32.vlgmr.msra.gmra.mrb[10].mxu1 %vm21_vm0, %v1143_v8 }
 0xe74   :  { %3302 = vmatprep.subr.bf16.mxu1 %v3301_v4 }
 0xe75   :  { %3304 = vmatpush3.bf16.msra.mxu1 %v3301_v4 }
 0xf46   :  { %v3082_v22 = vpop.f32.mrb[10].mxu1 }
 0xf47   :  { %v1227_v38 = vadd.f32 %v3082_v22, %v2817_v40  ;;  %v1221_v23 = vpop.f32.mrb[11].mxu1 }
 0xf48   :  { %v1222_v24 = vadd.f32 %v2817_v40, %v1221_v23  ;;  %v2825_v23 = vld [vmem:[%s4127_s3 + $0xb] ss:$0 sm:$0xff] }
 0xf49   :  { %v1233_v25 = vmul.f32 0.044715, %v1227_v38  ;;  %v1231_v43 = vmul.f32 0.5, %v1227_v38 }
 0xf4a   :  { %v1232_v26 = vmul.f32 0.044715, %v1222_v24  ;;  %v1230_v39 = vmul.f32 0.5, %v1222_v24 }
 0xf4b   :  { %v1235_v27 = vmul.f32 %v1233_v25, %v1227_v38 }
 0xf4c   :  { %v1234_v20 = vmul.f32 %v1232_v26, %v1222_v24 }
 0xf4d   :  { %v1237_v28 = vmul.f32 %v1235_v27, %v1227_v38 }
 0xf4e   :  { %v1236_v29 = vmul.f32 %v1234_v20, %v1222_v24 }
 0xf4f   :  { %v1239_v19 = vadd.f32 %v1237_v28, %v1227_v38 }
 0xf50   :  { %v1238_v30 = vadd.f32 %v1236_v29, %v1222_v24 }
 0xf51   :  { %v1241_v31 = vmul.f32 0.7978846, %v1239_v19 }
 0xf52   :  { %v1240_v32 = vmul.f32 0.7978846, %v1238_v30 }
 0xf53   :  { %3523 = vtanh.f32 %v1241_v31 }
 0xf54   :  { %3525 = vtanh.f32 %v1240_v32 }
 0xf5d   :  { %v3524_v34 = vpop.eup %3523 }
 0xf5e   :  { %v3526_v36 = vpop.eup %3525  ;;  %v1245_v37 = vadd.f32 1.0, %v3524_v34 }
 0xf5f   :  { %v1244_v42 = vadd.f32 1.0, %v3526_v36 }
 0xf60   :  { %v1247_v46 = vmul.f32 %v1245_v37, %v1231_v43 }
 0xf61   :  { %v1246_v44 = vmul.f32 %v1244_v42, %v1230_v39 }
 0xf63   :  { %3099 = vmatprep.mubr.msk.f32.mxu0 %vm1253_vm5, %v1246_v44 }
 0xf64   :  { %3100 = vmatmul.mubr.msk.f32.vlgmr.msra.gmra.mrb[10].mxu0 %vm1253_vm5, %v1247_v46 }
0x1037   :  { %v3101_v48 = vpop.f32.mrb[10].mxu0 }
0x1038   :  { %v1332_v50 = vadd.f32 %v3101_v48, %v2820_v47  ;;  %v1326_v35 = vpop.f32.mrb[11].mxu0 }
0x1039   :  { %v1327_v33 = vadd.f32 %v2820_v47, %v1326_v35 }
0x103a   :  { %v1336_v51 = vadd.f32 %v1332_v50, %v1143_v8 }
0x103b   :  { %v1335_v53 = vadd.f32 %v1327_v33, %v1142_v6  ;;  %v1380_v6 = vld [vmem:[%s4126_s2 + $0xb8] sm:$0xff] }
0x103c   :  { %v1342_v54 = vsel %vm21_vm0, %v1336_v51, 0.0  ;;  %v3305_v7 = vpack.c.bf16 %v1380_v6, %v1379_v5 }
0x103d   :  { %1343 = vadd.xlane.f32.xlu1 %v1342_v54  ;;  %v1339_v55 = vsel %vm21_vm0, %v1335_v53, 0.0 }
0x103e   :  { %1340 = vadd.xlane.f32.xlu0 %v1339_v55  ;;  %3306 = vmatprep.subr.bf16.mxu1 %v3305_v7 }
0x103f   :  { %3308 = vmatpush3.bf16.msra.mxu1 %v3305_v7 }
0x10ca   :  { %v1344_v56 = vpop.xlane.xlu1 %1343 }
0x10cb   :  { %v1346_v57 = vmul.f32 0.03125, %v1344_v56  ;;  %v1341_v58 = vpop.xlane.xlu0 %1340 }
0x10cc   :  { %v1345_v59 = vmul.f32 0.03125, %v1341_v58 }
0x10cd   :  { %v1348_v60 = vsub.f32 %v1336_v51, %v1346_v57 }
0x10ce   :  { %v1347_v61 = vsub.f32 %v1335_v53, %v1345_v59 }
0x10cf   :  { %v1350_v41 = vmul.f32 %v1348_v60, %v1348_v60 }
0x10d0   :  { %v1349_v62 = vmul.f32 %v1347_v61, %v1347_v61 }
0x10d1   :  { %v1354_v63 = vsel %vm21_vm0, %v1350_v41, 0.0 }
0x10d2   :  { %1355 = vadd.xlane.f32.xlu1 %v1354_v63  ;;  %v1351_v1 = vsel %vm21_vm0, %v1349_v62, 0.0 }
0x10d3   :  { %1352 = vadd.xlane.f32.xlu0 %v1351_v1 }
0x115f   :  { %v1356_v8 = vpop.xlane.xlu1 %1355 }
0x1160   :  { %v1358_v9 = vmul.f32 0.03125, %v1356_v8  ;;  %v1353_v0 = vpop.xlane.xlu0 %1352 }
0x1161   :  { %v1357_v10 = vmul.f32 0.03125, %v1353_v0 }
0x1162   :  { %v1360_v11 = vadd.f32 1e-12, %v1358_v9 }
0x1163   :  { %v1359_v12 = vadd.f32 1e-12, %v1357_v10 }
0x1164   :  { %3527 = vrsqrt.f32 %v1360_v11 }
0x1165   :  { %3529 = vrsqrt.f32 %v1359_v12 }
0x116e   :  { %v3528_v13 = vpop.eup %3527 }
0x116f   :  { %v3530_v15 = vpop.eup %3529  ;;  %v1364_v16 = vmul.f32 %v3528_v13, %v1348_v60 }
0x1170   :  { %v1363_v17 = vmul.f32 %v3530_v15, %v1347_v61 }
0x1171   :  { %v1370_v21 = vmul.f32 %v2823_v14, %v1364_v16 }
0x1172   :  { %v1369_v40 = vmul.f32 %v2823_v14, %v1363_v17 }
0x1173   :  { %v3888_v38 = vadd.f32 %v2824_v18, %v1370_v21 }
0x1174   :  { %v3886_v22 = vadd.f32 %v2824_v18, %v1369_v40 }
0x1176   :  { %3110 = vmatprep.mubr.msk.f32.mxu1 %vm21_vm0, %v3886_v22 }
0x1177   :  { %3111 = vmatmul.mubr.msk.f32.vlgmr.msra.gmra.mrb[12].mxu1 %vm21_vm0, %v3888_v38 }
0x124a   :  { %v3112_v24 = vpop.f32.mrb[12].mxu1 }
0x124b   :  { %v3897_v25 = vadd.f32 %v3112_v24, %v2825_v23  ;;  %v1474_v26 = vpop.f32.mrb[13].mxu1 }
0x124c   :  { %v3899_v27 = vadd.f32 %v2825_v23, %v1474_v26 }
0x124e   :  { %3117 = vmatprep.mubr.msk.f32.mxu1 %vm175_vm1, %v3899_v27  ;;  %v3905_v20 = vpack.i.bf16 %v3897_v25, %v3899_v27 }
0x1250   :  { %3449 = vrot.lane.b32.xlu1 %v3905_v20, %s3578_s7  ;;  %3444 = vrot.lane.b32.xlu0 %v3905_v20, %s3577_s6 }
0x1254   :  { %1685 = vrot.lane.b32.xlu1 %v3899_v27, %s3579_s8 }
0x1258   :  { %1687 = vrot.lane.b32.xlu1 %v3897_v25, %s3579_s8 }
0x12c2   :  { %v3450_v28 = vpop.permute.xlu1 %3449  ;;  %v3445_v29 = vpop.permute.xlu0 %3444 }
0x12c3   :  { %v3452_v19 = vunpack.i.h.bf16 %v3450_v28  ;;  %v3451_v30 = vunpack.i.l.bf16 %v3450_v28  ;;  %v3447_v31 = vunpack.i.h.bf16 %v3445_v29  ;;  %v3446_v32 = vunpack.i.l.bf16 %v3445_v29 }
0x12c5   :  { %v3309_v34 = vpack.c.bf16 %v3447_v31, %v3446_v32  ;;  %v3319_v36 = vpack.c.bf16 %v3452_v19, %v3451_v30 }
0x12c6   :  { %v1686_v37 = vpop.permute.xlu1 %1685 }
0x12c7   :  { %3311 = vmatprep.subr.msk.bf16.mxu1 %vm3675_vm2, %v3309_v34 }
0x12c8   :  { %3314 = vmatpush3.bf16.xpose.msk.msra.mxu1 %vm3675_vm2, %v3309_v34 }
0x12c9   :  { %3321 = vmatprep.subr.msk.bf16.mxu1 %vm3675_vm2, %v3319_v36 }
0x12ca   :  { %v1688_v39 = vpop.permute.xlu1 %1687 }
0x12cf   :  { %3118 = vmatmul.mubr.msk.f32.vlgmr.msra.gmra.mrb[14].mxu1 %vm175_vm1, %v3897_v25 }
0x12d0   :  { %3324 = vmatpush3.bf16.xpose.msk.msra.mxu1 %vm3675_vm2, %v3319_v36  ;;  %3131 = vmatprep.mubr.msk.f32.mxu1 %vm175_vm1, %v1686_v37 }
0x12d7   :  { %3132 = vmatmul.mubr.msk.f32.vlgmr.msra.gmra.mrb[16].mxu1 %vm175_vm1, %v1688_v39 }
0x13a2   :  { %v3119_v42 = vpop.f32.mrb[14].mxu1 }
0x13a3   :  { %v1573_v43 = vmul.f32 0.35355338, %v3119_v42  ;;  %v1563_v44 = vpop.f32.mrb[15].mxu1 }
0x13a4   :  { %v1572_v46 = vmul.f32 0.35355338, %v1563_v44 }
0x13a5   :  { %v1575_v47 = vadd.f32 %v1573_v43, %v3693_v52 }
0x13a6   :  { %v1574_v48 = vadd.f32 %v1572_v46, %v3688_v49 }
0x13a7   :  { %v1579_v50 = vsel %vm263_vm3, %v1575_v47, -inf }
0x13a8   :  { %1580 = vmax.xlane.f32.xlu1 %v1579_v50  ;;  %v1576_v35 = vsel %vm263_vm3, %v1574_v48, -inf }
0x13a9   :  { %1577 = vmax.xlane.f32.xlu0 %v1576_v35 }
0x13aa   :  { %v3133_v33 = vpop.f32.mrb[16].mxu1 }
0x13ab   :  { %v1767_v51 = vpop.f32.mrb[17].mxu1  ;;  %v1777_v53 = vmul.f32 0.35355338, %v3133_v33 }
0x13ac   :  { %v1776_v54 = vmul.f32 0.35355338, %v1767_v51 }
0x13ad   :  { %v1779_v57 = vadd.f32 %v1777_v53, %v3693_v52 }
0x13ae   :  { %v1778_v55 = vadd.f32 %v1776_v54, %v3688_v49 }
0x13af   :  { %v1783_v58 = vsel %vm263_vm3, %v1779_v57, -inf }
0x13b0   :  { %v1780_v56 = vsel %vm263_vm3, %v1778_v55, -inf }
0x13b1   :  { %1781 = vmax.xlane.f32.xlu0 %v1780_v56 }
0x13b5   :  { %1784 = vmax.xlane.f32.xlu0 %v1783_v58 }
0x1435   :  { %v1581_v59 = vpop.xlane.xlu1 %1580 }
0x1436   :  { %v1583_v60 = vsub.f32 %v1575_v47, %v1581_v59  ;;  %v1578_v61 = vpop.xlane.xlu0 %1577 }
0x1437   :  { %v1582_v41 = vsub.f32 %v1574_v48, %v1578_v61 }
0x1438   :  { %v1586_v62 = vmul.f32 1.442695, %v1583_v60 }
0x1439   :  { %v1584_v63 = vmul.f32 1.442695, %v1582_v41 }
0x143a   :  { %3531 = vpow2.f32 %v1586_v62 }
0x143b   :  { %3533 = vpow2.f32 %v1584_v63 }
0x143e   :  { %v1782_v1 = vpop.xlane.xlu0 %1781 }
0x143f   :  { %v1786_v2 = vsub.f32 %v1778_v55, %v1782_v1  ;;  %v3575_v55 = vld [vmem:[%s4128_s1 + $0x8] sm:$0xff] }
0x1441   :  { %v1788_v3 = vmul.f32 1.442695, %v1786_v2 }
0x1442   :  { %v1785_v49 = vpop.xlane.xlu0 %1784 }
0x1443   :  { %3535 = vpow2.f32 %v1788_v3  ;;  %v1787_v4 = vsub.f32 %v1779_v57, %v1785_v49  ;;  %v3576_v57 = vld [vmem:[%s4128_s1] sm:$0xff] }
0x1444   :  { %v3532_v5 = vpop.eup %3531 }
0x1445   :  { %v3534_v52 = vpop.eup %3533  ;;  %v1790_v6 = vmul.f32 1.442695, %v1787_v4  ;;  %v1591_v7 = vsel %vm263_vm3, %v3532_v5, 0.0 }
0x1446   :  { %1592 = vadd.xlane.f32.xlu1 %v1591_v7  ;;  %v1588_v8 = vsel %vm263_vm3, %v3534_v52, 0.0 }
0x1447   :  { %3537 = vpow2.f32 %v1790_v6  ;;  %1589 = vadd.xlane.f32.xlu0 %v1588_v8 }
0x144d   :  { %v3536_v9 = vpop.eup %3535 }
0x144e   :  { %v1792_v0 = vsel %vm263_vm3, %v3536_v9, 0.0 }
0x144f   :  { %1793 = vadd.xlane.f32.xlu0 %v1792_v0 }
0x1451   :  { %v3538_v10 = vpop.eup %3537 }
0x1452   :  { %v1795_v11 = vsel %vm263_vm3, %v3538_v10, 0.0 }
0x1453   :  { %1796 = vadd.xlane.f32.xlu1 %v1795_v11 }
0x1464   :  { %3459 = vrot.lane.b32.xlu1 %v3905_v20, %s3581_s14 }
0x1465   :  { %3454 = vrot.lane.b32.xlu0 %v3905_v20, %s3580_s13 }
0x1468   :  { %3464 = vrot.lane.b32.xlu1 %v3905_v20, %s3583_s16 }
0x1469   :  { %1891 = vrot.lane.b32.xlu0 %v3897_v25, %s3582_s15 }
0x146c   :  { %1889 = vrot.lane.b32.xlu1 %v3899_v27, %s3582_s15 }
0x14d3   :  { %v1593_v13 = vpop.xlane.xlu1 %1592 }
0x14d4   :  { %v1590_v12 = vpop.xlane.xlu0 %1589 }
0x14d5   :  { %3539 = vrcp.f32 %v1590_v12 }
0x14d6   :  { %3541 = vrcp.f32 %v1593_v13 }
0x14dc   :  { %v1794_v14 = vpop.xlane.xlu0 %1793 }
0x14dd   :  { %3543 = vrcp.f32 %v1794_v14 }
0x14df   :  { %v3540_v15 = vpop.eup %3539 }
0x14e0   :  { %v1797_v16 = vpop.xlane.xlu1 %1796  ;;  %v3455_v17 = vpop.permute.xlu0 %3454  ;;  %v1596_v18 = vmul.f32 %v3540_v15, %v3534_v52 }
0x14e1   :  { %3545 = vrcp.f32 %v1797_v16  ;;  %v3457_v21 = vunpack.i.h.bf16 %v3455_v17  ;;  %v3456_v40 = vunpack.i.l.bf16 %v3455_v17  ;;  %v3542_v24 = vpop.eup %3541 }
0x14e2   :  { %3124 = vmatprep.mubr.msk.f32.mxu0 %vm263_vm3, %v1596_v18  ;;  %v1597_v30 = vmul.f32 %v3542_v24, %v3532_v5 }
0x14e3   :  { %v3315_v23 = vpack.c.bf16 %v3457_v21, %v3456_v40 }
0x14e4   :  { %v3460_v26 = vpop.permute.xlu1 %3459  ;;  %v1892_v46 = vpop.permute.xlu0 %1891 }
0x14e5   :  { %v3462_v28 = vunpack.i.h.bf16 %v3460_v26  ;;  %v3461_v29 = vunpack.i.l.bf16 %v3460_v26  ;;  %3316 = vmatprep.subr.bf16.mxu0 %v3315_v23 }
0x14e6   :  { %3318 = vmatpush3.bf16.msra.mxu0 %v3315_v23 }
0x14e7   :  { %v3544_v19 = vpop.eup %3543  ;;  %v3325_v31 = vpack.c.bf16 %v3462_v28, %v3461_v29 }
0x14e8   :  { %v3465_v32 = vpop.permute.xlu1 %3464  ;;  %v1800_v34 = vmul.f32 %v3544_v19, %v3536_v9 }
0x14e9   :  { %v3467_v36 = vunpack.i.h.bf16 %v3465_v32  ;;  %v3466_v37 = vunpack.i.l.bf16 %v3465_v32  ;;  %3125 = vmatmul.mubr.msk.f32.vlgmr.msra.gmra.mrb[12].mxu0 %vm263_vm3, %v1597_v30  ;;  %3326 = vmatprep.subr.bf16.mxu0 %v3325_v31 }
0x14ea   :  { %3328 = vmatpush3.bf16.msra.mxu0 %v3325_v31  ;;  %3138 = vmatprep.mubr.msk.f32.mxu0 %vm263_vm3, %v1800_v34 }
0x14eb   :  { %v3546_v39 = vpop.eup %3545  ;;  %v3329_v42 = vpack.c.bf16 %v3467_v36, %v3466_v37 }
0x14ec   :  { %v1801_v43 = vmul.f32 %v3546_v39, %v3538_v10  ;;  %v1890_v44 = vpop.permute.xlu1 %1889 }
0x14ed   :  { %3331 = vmatprep.subr.msk.bf16.mxu0 %vm3675_vm2, %v3329_v42 }
0x14ee   :  { %3139 = vmatmul.mubr.msk.f32.vlgmr.msra.gmra.mrb[14].mxu0 %vm263_vm3, %v1801_v43 }
0x14ef   :  { %3145 = vmatprep.mubr.msk.f32.mxu0 %vm175_vm1, %v1890_v44 }
0x14f3   :  { %3334 = vmatpush3.bf16.xpose.msk.msra.mxu0 %vm3675_vm2, %v3329_v42 }
0x14fa   :  { %3146 = vmatmul.mubr.msk.f32.vlgmr.msra.gmra.mrb[16].mxu0 %vm175_vm1, %v1892_v46 }
0x15bc   :  { %v3959_v47 = vpop.f32.mrb[12].mxu0 }
0x15bd   :  { %v3961_v48 = vpop.f32.mrb[13].mxu0 }
0x15c1   :  { %v3963_v50 = vpop.f32.mrb[14].mxu0 }
0x15c2   :  { %v3965_v35 = vpop.f32.mrb[15].mxu0 }
0x15cd   :  { %v3147_v33 = vpop.f32.mrb[16].mxu0 }
0x15ce   :  { %v1981_v51 = vmul.f32 0.35355338, %v3147_v33  ;;  %v1971_v53 = vpop.f32.mrb[17].mxu0 }
0x15cf   :  { %v1980_v54 = vmul.f32 0.35355338, %v1971_v53 }
0x15d0   :  { %v1983_v56 = vadd.f32 %v3575_v55, %v1981_v51 }
0x15d1   :  { %v1982_v58 = vadd.f32 %v3576_v57, %v1980_v54 }
0x15d2   :  { %v1987_v59 = vsel %vm263_vm3, %v1983_v56, -inf }
0x15d3   :  { %1988 = vmax.xlane.f32.xlu0 %v1987_v59  ;;  %v1984_v60 = vsel %vm263_vm3, %v1982_v58, -inf  ;;  %v1383_v59 = vld [vmem:[%s4126_s2 + $0xd0] sm:$0xff] }
0x15d4   :  { %1985 = vmax.xlane.f32.xlu1 %v1984_v60 }
0x15e5   :  { %3469 = vrot.lane.b32.xlu1 %v3905_v20, %s3584_s17 }
0x15e9   :  { %2093 = vrot.lane.b32.xlu1 %v3899_v27, %s3585_s18 }
0x15ed   :  { %2095 = vrot.lane.b32.xlu1 %v3897_v25, %s3585_s18 }
0x1660   :  { %v1989_v61 = vpop.xlane.xlu0 %1988 }
0x1661   :  { %v1991_v41 = vsub.f32 %v1983_v56, %v1989_v61  ;;  %v1986_v62 = vpop.xlane.xlu1 %1985  ;;  %v1384_v61 = vld [vmem:[%s4126_s2 + $0xd8] sm:$0xff] }
0x1662   :  { %v1990_v63 = vsub.f32 %v1982_v58, %v1986_v62  ;;  %v1381_v58 = vld [vmem:[%s4126_s2 + $0xc0] sm:$0xff] }
0x1663   :  { %v1994_v1 = vmul.f32 1.442695, %v1991_v41  ;;  %v3353_v41 = vpack.c.bf16 %v1384_v61, %v1383_v59  ;;  %v1393_v59 = vld [vmem:[%s4126_s2 + $0x120] sm:$0xff]  ;;  %v1394_v61 = vld [vmem:[%s4126_s2 + $0x128] sm:$0xff] }
0x1664   :  { %v1992_v2 = vmul.f32 1.442695, %v1990_v63 }
0x1665   :  { %3547 = vpow2.f32 %v1994_v1  ;;  %v3470_v3 = vpop.permute.xlu1 %3469 }
0x1666   :  { %v3472_v49 = vunpack.i.h.bf16 %v3470_v3  ;;  %v3471_v4 = vunpack.i.l.bf16 %v3470_v3  ;;  %3549 = vpow2.f32 %v1992_v2 }
0x1668   :  { %v3335_v5 = vpack.c.bf16 %v3472_v49, %v3471_v4 }
0x1669   :  { %v2094_v16 = vpop.permute.xlu1 %2093 }
0x166a   :  { %3336 = vmatprep.subr.bf16.mxu1 %v3335_v5 }
0x166b   :  { %3338 = vmatpush3.bf16.msra.mxu1 %v3335_v5 }
0x166d   :  { %v2096_v17 = vpop.permute.xlu1 %2095 }
0x166f   :  { %v3548_v52 = vpop.eup %3547 }
0x1670   :  { %v1999_v27 = vsel %vm263_vm3, %v3548_v52, 0.0  ;;  %v3550_v6 = vpop.eup %3549 }
0x1671   :  { %2000 = vadd.xlane.f32.xlu0 %v1999_v27  ;;  %v1996_v25 = vsel %vm263_vm3, %v3550_v6, 0.0 }
0x1675   :  { %1997 = vadd.xlane.f32.xlu0 %v1996_v25 }
0x168b   :  { %3474 = vrot.lane.b32.xlu0 %v3905_v20, %s3586_s0 }
0x16fe   :  { %v2001_v7 = vpop.xlane.xlu0 %2000 }
0x16ff   :  { %3551 = vrcp.f32 %v2001_v7 }
0x1702   :  { %v1998_v8 = vpop.xlane.xlu0 %1997 }
0x1703   :  { %3553 = vrcp.f32 %v1998_v8 }
0x1706   :  { %v3475_v9 = vpop.permute.xlu0 %3474 }
0x1707   :  { %v3477_v0 = vunpack.i.h.bf16 %v3475_v9  ;;  %v3476_v10 = vunpack.i.l.bf16 %v3475_v9 }
0x1709   :  { %v3339_v11 = vpack.c.bf16 %v3477_v0, %v3476_v10  ;;  %v3552_v12 = vpop.eup %3551 }
0x170a   :  { %v2005_v15 = vmul.f32 %v3552_v12, %v3548_v52 }
0x170b   :  { %3341 = vmatprep.subr.msk.bf16.mxu1 %vm3675_vm2, %v3339_v11 }
0x170d   :  { %v3554_v13 = vpop.eup %3553 }
0x170e   :  { %v2004_v14 = vmul.f32 %v3554_v13, %v3550_v6 }
0x1710   :  { %3152 = vmatprep.mubr.msk.f32.mxu1 %vm263_vm3, %v2004_v14 }
0x1711   :  { %3153 = vmatmul.mubr.msk.f32.vlgmr.msra.gmra.mrb[18].mxu1 %vm263_vm3, %v2005_v15 }
0x1712   :  { %3344 = vmatpush3.bf16.xpose.msk.msra.mxu1 %vm3675_vm2, %v3339_v11  ;;  %3159 = vmatprep.mubr.msk.f32.mxu1 %vm175_vm1, %v2094_v16 }
0x1719   :  { %3160 = vmatmul.mubr.msk.f32.vlgmr.msra.gmra.mrb[20].mxu1 %vm175_vm1, %v2096_v17 }
0x17e4   :  { %v3154_v18 = vpop.f32.mrb[18].mxu1 }
0x17e5   :  { %v2084_v21 = vpop.f32.mrb[19].mxu1 }
0x17ec   :  { %v3161_v40 = vpop.f32.mrb[20].mxu1 }
0x17ed   :  { %v2185_v23 = vmul.f32 0.35355338, %v3161_v40  ;;  %v2175_v24 = vpop.f32.mrb[21].mxu1 }
0x17ee   :  { %v2184_v26 = vmul.f32 0.35355338, %v2175_v24 }
0x17ef   :  { %v2187_v28 = vadd.f32 %v3575_v55, %v2185_v23 }
0x17f0   :  { %v2186_v29 = vadd.f32 %v3576_v57, %v2184_v26 }
0x17f1   :  { %v2191_v19 = vsel %vm263_vm3, %v2187_v28, -inf }
0x17f2   :  { %2192 = vmax.xlane.f32.xlu0 %v2191_v19  ;;  %v2188_v30 = vsel %vm263_vm3, %v2186_v29, -inf  ;;  %v1387_v19 = vld [vmem:[%s4126_s2 + $0xf0] sm:$0xff] }
0x17f3   :  { %2189 = vmax.xlane.f32.xlu1 %v2188_v30  ;;  %v1388_v30 = vld [vmem:[%s4126_s2 + $0xf8] sm:$0xff] }
0x1804   :  { %3479 = vrot.lane.b32.xlu1 %v3905_v20, %s3587_s19 }
0x1808   :  { %2301 = vrot.lane.b32.xlu1 %v3963_v50, %s3588_s20 }
0x180c   :  { %2307 = vrot.lane.b32.xlu1 %v2084_v21, %s3589_s21 }
0x1810   :  { %2309 = vrot.lane.b32.xlu1 %v3154_v18, %s3589_s21 }
0x187f   :  { %v2193_v45 = vpop.xlane.xlu0 %2192 }
0x1880   :  { %v2195_v31 = vsub.f32 %v2187_v28, %v2193_v45  ;;  %v2190_v32 = vpop.xlane.xlu1 %2189  ;;  %v1386_v28 = vld [vmem:[%s4126_s2 + $0xe8] sm:$0xff]  ;;  %v3361_v45 = vpack.c.bf16 %v1388_v30, %v1387_v19 }
0x1881   :  { %v2194_v34 = vsub.f32 %v2186_v29, %v2190_v32 }
0x1882   :  { %v2198_v36 = vmul.f32 1.442695, %v2195_v31 }
0x1883   :  { %v2196_v37 = vmul.f32 1.442695, %v2194_v34 }
0x1884   :  { %v3480_v39 = vpop.permute.xlu1 %3479 }
0x1885   :  { %3555 = vpow2.f32 %v2196_v37  ;;  %v3482_v42 = vunpack.i.h.bf16 %v3480_v39  ;;  %v3481_v43 = vunpack.i.l.bf16 %v3480_v39 }
0x1886   :  { %3557 = vpow2.f32 %v2198_v36 }
0x1887   :  { %v3345_v44 = vpack.c.bf16 %v3482_v42, %v3481_v43  ;;  %v2855_v43 = vld [vmem:[%s4127_s3 + $0xd] ss:$0 sm:$0xff] }
0x1888   :  { %v2302_v1 = vpop.permute.xlu1 %2301 }
0x1889   :  { %3346 = vmatprep.subr.bf16.mxu0 %v3345_v44  ;;  %v2322_v52 = vsel %vm175_vm1, %v3959_v47, %v2302_v1 }
0x188a   :  { %3348 = vmatpush3.bf16.msra.mxu0 %v3345_v44 }
0x188c   :  { %v2308_v2 = vpop.permute.xlu1 %2307 }
0x188f   :  { %v3556_v20 = vpop.eup %3555 }
0x1890   :  { %v2200_v46 = vsel %vm263_vm3, %v3556_v20, 0.0  ;;  %v3558_v50 = vpop.eup %3557  ;;  %v2310_v49 = vpop.permute.xlu1 %2309 }
0x1891   :  { %2201 = vadd.xlane.f32.xlu0 %v2200_v46  ;;  %v2203_v33 = vsel %vm263_vm3, %v3558_v50, 0.0  ;;  %v2324_v25 = vsel %vm263_vm3, %v2322_v52, %v2310_v49 }
0x1895   :  { %2204 = vadd.xlane.f32.xlu0 %v2203_v33 }
0x18ab   :  { %2299 = vrot.lane.b32.xlu0 %v3965_v35, %s3588_s20  ;;  %v1382_v35 = vld [vmem:[%s4126_s2 + $0xc8] sm:$0xff] }
0x18ac   :  { %v3349_v60 = vpack.c.bf16 %v1382_v35, %v1381_v58  ;;  %v1391_v58 = vld [vmem:[%s4126_s2 + $0x110] sm:$0xff]  ;;  %v1392_v35 = vld [vmem:[%s4126_s2 + $0x118] sm:$0xff] }
0x18ae   :  { %3350 = vmatprep.subr.bf16.mxu0 %v3349_v60 }
0x191e   :  { %v2202_v51 = vpop.xlane.xlu0 %2201 }
0x191f   :  { %3559 = vrcp.f32 %v2202_v51 }
0x1922   :  { %v2205_v53 = vpop.xlane.xlu0 %2204 }
0x1923   :  { %3561 = vrcp.f32 %v2205_v53 }
0x1926   :  { %v2300_v3 = vpop.permute.xlu0 %2299 }
0x1927   :  { %v2321_v4 = vsel %vm175_vm1, %v3961_v48, %v2300_v3  ;;  %v2852_v48 = vld [vmem:[%s4127_s3 + $0xc] ss:$0 sm:$0xff] }
0x1928   :  { %v2323_v27 = vsel %vm263_vm3, %v2321_v4, %v2308_v2  ;;  %v2857_v2 = vld [vmem:[%s4127_s3 + $0xf] ss:$0 sm:$0xff] }
0x1929   :  { %v3560_v54 = vpop.eup %3559 }
0x192a   :  { %v2208_v55 = vmul.f32 %v3560_v54, %v3556_v20  ;;  %v2856_v20 = vld [vmem:[%s4127_s3 + $0xe] ss:$0 sm:$0xff] }
0x192c   :  { %3166 = vmatprep.mubr.msk.f32.mxu0 %vm263_vm3, %v2208_v55  ;;  %v1389_v55 = vld [vmem:[%s4126_s2 + $0x100] sm:$0xff] }
0x192d   :  { %v3562_v56 = vpop.eup %3561 }
0x192e   :  { %v2209_v57 = vmul.f32 %v3562_v56, %v3558_v50  ;;  %v1390_v56 = vld [vmem:[%s4126_s2 + $0x108] sm:$0xff] }
0x1930   :  { %3167 = vmatmul.mubr.msk.f32.vlgmr.msra.gmra.mrb[18].mxu0 %vm263_vm3, %v2209_v57  ;;  %v3365_v57 = vpack.c.bf16 %v1390_v56, %v1389_v55 }
0x1931   :  { %3352 = vmatpush3.bf16.msra.mxu0 %v3349_v60  ;;  %v3369_v60 = vpack.c.bf16 %v1392_v35, %v1391_v58  ;;  %v2863_v58 = vld [vmem:[%s4127_s3 + $0x11] ss:$0 sm:$0xff] }
0x1932   :  { %3354 = vmatprep.subr.bf16.mxu0 %v3353_v41 }
0x1935   :  { %3356 = vmatpush3.bf16.msra.mxu0 %v3353_v41  ;;  %v3373_v41 = vpack.c.bf16 %v1394_v61, %v1393_v59  ;;  %v2864_v61 = vld [vmem:[%s4127_s3 + $0x12] ss:$0 sm:$0xff] }
0x1936   :  { %3366 = vmatprep.subr.bf16.mxu0 %v3365_v57 }
0x1a03   :  { %v3168_v62 = vpop.f32.mrb[18].mxu0 }
0x1a04   :  { %2317 = vrot.lane.b32.xlu1 %v3168_v62, %s3590_s30  ;;  %v2288_v63 = vpop.f32.mrb[19].mxu0  ;;  %v1395_v62 = vld [vmem:[%s4126_s2 + $0x130] sm:$0xff] }
0x1a05   :  { %2315 = vrot.lane.b32.xlu0 %v2288_v63, %s3590_s30  ;;  %v1396_v63 = vld [vmem:[%s4126_s2 + $0x138] sm:$0xff] }
0x1a06   :  { %v3377_v1 = vpack.c.bf16 %v1396_v63, %v1395_v62 }
0x1a76   :  { %v2318_v5 = vpop.permute.xlu1 %2317 }
0x1a77   :  { %v2316_v6 = vpop.permute.xlu0 %2315  ;;  %v2326_v8 = vsel %vm1013_vm4, %v2324_v25, %v2318_v5 }
0x1a78   :  { %v2325_v7 = vsel %vm1013_vm4, %v2323_v27, %v2316_v6 }
0x1a79   :  { %3177 = vmatprep.mubr.msk.f32.mxu0 %vm21_vm0, %v2325_v7 }
0x1a7a   :  { %3178 = vmatmul.mubr.msk.f32.vlgmr.msra.gmra.mrb[20].mxu0 %vm21_vm0, %v2326_v8 }
0x1a7b   :  { %3368 = vmatpush3.bf16.msra.mxu0 %v3365_v57 }
0x1a7c   :  { %3370 = vmatprep.subr.bf16.mxu0 %v3369_v60 }
0x1a7f   :  { %3372 = vmatpush3.bf16.msra.mxu0 %v3369_v60 }
0x1a80   :  { %3374 = vmatprep.subr.bf16.mxu0 %v3373_v41 }
0x1a83   :  { %3376 = vmatpush3.bf16.msra.mxu0 %v3373_v41 }
0x1a84   :  { %3378 = vmatprep.subr.bf16.mxu0 %v3377_v1 }
0x1a87   :  { %3380 = vmatpush3.bf16.msra.mxu0 %v3377_v1 }
0x1b4d   :  { %v3179_v9 = vpop.f32.mrb[20].mxu0 }
0x1b4e   :  { %v2410_v0 = vadd.f32 %v3179_v9, %v2852_v48  ;;  %v2404_v47 = vpop.f32.mrb[21].mxu0 }
0x1b4f   :  { %v2405_v10 = vadd.f32 %v2852_v48, %v2404_v47 }
0x1b50   :  { %v2414_v11 = vadd.f32 %v2410_v0, %v3888_v38 }
0x1b51   :  { %v2413_v12 = vadd.f32 %v2405_v10, %v3886_v22  ;;  %v1385_v22 = vld [vmem:[%s4126_s2 + $0xe0] sm:$0xff] }
0x1b52   :  { %v2420_v13 = vsel %vm21_vm0, %v2414_v11, 0.0  ;;  %v3357_v29 = vpack.c.bf16 %v1386_v28, %v1385_v22 }
0x1b53   :  { %2421 = vadd.xlane.f32.xlu1 %v2420_v13  ;;  %v2417_v14 = vsel %vm21_vm0, %v2413_v12, 0.0 }
0x1b54   :  { %2418 = vadd.xlane.f32.xlu0 %v2417_v14  ;;  %3358 = vmatprep.subr.bf16.mxu1 %v3357_v29 }
0x1b55   :  { %3360 = vmatpush3.bf16.msra.mxu1 %v3357_v29 }
0x1b56   :  { %3362 = vmatprep.subr.bf16.mxu1 %v3361_v45 }
0x1b59   :  { %3364 = vmatpush3.bf16.msra.mxu1 %v3361_v45 }
0x1be0   :  { %v2422_v15 = vpop.xlane.xlu1 %2421 }
0x1be1   :  { %v2424_v16 = vmul.f32 0.03125, %v2422_v15  ;;  %v2419_v17 = vpop.xlane.xlu0 %2418 }
0x1be2   :  { %v2423_v18 = vmul.f32 0.03125, %v2419_v17 }
0x1be3   :  { %v2426_v21 = vsub.f32 %v2414_v11, %v2424_v16 }
0x1be4   :  { %v2425_v40 = vsub.f32 %v2413_v12, %v2423_v18  ;;  %v2860_v18 = vld [vmem:[%s4127_s3 + $0x10] ss:$0 sm:$0xff] }
0x1be5   :  { %v2428_v26 = vmul.f32 %v2426_v21, %v2426_v21 }
0x1be6   :  { %v2427_v23 = vmul.f32 %v2425_v40, %v2425_v40 }
0x1be7   :  { %v2432_v38 = vsel %vm21_vm0, %v2428_v26, 0.0 }
0x1be8   :  { %v2429_v24 = vsel %vm21_vm0, %v2427_v23, 0.0 }
0x1be9   :  { %2430 = vadd.xlane.f32.xlu0 %v2429_v24 }
0x1bed   :  { %2433 = vadd.xlane.f32.xlu0 %v2432_v38 }
0x1c76   :  { %v2431_v31 = vpop.xlane.xlu0 %2430 }
0x1c77   :  { %v2435_v32 = vmul.f32 0.03125, %v2431_v31 }
0x1c79   :  { %v2437_v34 = vadd.f32 1e-12, %v2435_v32 }
0x1c7a   :  { %v2434_v36 = vpop.xlane.xlu0 %2433 }
0x1c7b   :  { %3563 = vrsqrt.f32 %v2437_v34  ;;  %v2436_v37 = vmul.f32 0.03125, %v2434_v36 }
0x1c7d   :  { %v2438_v39 = vadd.f32 1e-12, %v2436_v37 }
0x1c7f   :  { %3565 = vrsqrt.f32 %v2438_v39 }
0x1c85   :  { %v3564_v42 = vpop.eup %3563 }
0x1c86   :  { %v2441_v44 = vmul.f32 %v3564_v42, %v2425_v40  ;;  %v2687_v42 = vld [vmem:[%s4126_s2 + $0x140] sm:$0xff] }
0x1c88   :  { %v2447_v46 = vmul.f32 %v2855_v43, %v2441_v44 }
0x1c89   :  { %v3566_v50 = vpop.eup %3565 }
0x1c8a   :  { %v2442_v33 = vmul.f32 %v3566_v50, %v2426_v21  ;;  %v2453_v51 = vadd.f32 %v2856_v20, %v2447_v46  ;;  %v2690_v46 = vld [vmem:[%s4126_s2 + $0x158] sm:$0xff] }
0x1c8c   :  { %v2448_v53 = vmul.f32 %v2855_v43, %v2442_v33  ;;  %3188 = vmatprep.mubr.msk.f32.mxu1 %vm21_vm0, %v2453_v51  ;;  %v2688_v43 = vld [vmem:[%s4126_s2 + $0x148] sm:$0xff] }
0x1c8d   :  { %v3381_v44 = vpack.c.bf16 %v2688_v43, %v2687_v42 }
0x1c8e   :  { %v2454_v54 = vadd.f32 %v2856_v20, %v2448_v53  ;;  %v2689_v20 = vld [vmem:[%s4126_s2 + $0x150] sm:$0xff] }
0x1c8f   :  { %3382 = vmatprep.subr.bf16.mxu1 %v3381_v44  ;;  %v3385_v50 = vpack.c.bf16 %v2690_v46, %v2689_v20 }
0x1c90   :  { %3189 = vmatmul.mubr.msk.f32.vlgmr.msra.gmra.mrb[22].mxu1 %vm21_vm0, %v2454_v54 }
0x1c91   :  { %3384 = vmatpush3.bf16.msra.mxu1 %v3381_v44 }
0x1c92   :  { %3386 = vmatprep.subr.bf16.mxu1 %v3385_v50 }
0x1c95   :  { %3388 = vmatpush3.bf16.msra.mxu1 %v3385_v50 }
0x1d63   :  { %v3190_v3 = vpop.f32.mrb[22].mxu1 }
0x1d64   :  { %v2538_v49 = vadd.f32 %v3190_v3, %v2857_v2  ;;  %v2532_v4 = vpop.f32.mrb[23].mxu1 }
0x1d65   :  { %v2533_v5 = vadd.f32 %v2857_v2, %v2532_v4  ;;  %v2865_v2 = vld [vmem:[%s4127_s3 + $0x2] ss:$0 sm:$0xff] }
0x1d66   :  { %v2544_v52 = vmul.f32 0.044715, %v2538_v49  ;;  %v2542_v15 = vmul.f32 0.5, %v2538_v49 }
0x1d67   :  { %v2543_v27 = vmul.f32 0.044715, %v2533_v5  ;;  %v2541_v13 = vmul.f32 0.5, %v2533_v5 }
0x1d68   :  { %v2546_v6 = vmul.f32 %v2544_v52, %v2538_v49 }
0x1d69   :  { %v2545_v25 = vmul.f32 %v2543_v27, %v2533_v5 }
0x1d6a   :  { %v2548_v7 = vmul.f32 %v2546_v6, %v2538_v49 }
0x1d6b   :  { %v2547_v8 = vmul.f32 %v2545_v25, %v2533_v5 }
0x1d6c   :  { %v2550_v48 = vadd.f32 %v2548_v7, %v2538_v49 }
0x1d6d   :  { %v2549_v9 = vadd.f32 %v2547_v8, %v2533_v5 }
0x1d6e   :  { %v2552_v0 = vmul.f32 0.7978846, %v2550_v48 }
0x1d6f   :  { %v2551_v47 = vmul.f32 0.7978846, %v2549_v9 }
0x1d70   :  { %3567 = vtanh.f32 %v2552_v0 }
0x1d71   :  { %3569 = vtanh.f32 %v2551_v47 }
0x1d7a   :  { %v3568_v10 = vpop.eup %3567 }
0x1d7b   :  { %v3570_v11 = vpop.eup %3569  ;;  %v2556_v12 = vadd.f32 1.0, %v3568_v10 }
0x1d7c   :  { %v2555_v14 = vadd.f32 1.0, %v3570_v11 }
0x1d7d   :  { %v2558_v17 = vmul.f32 %v2556_v12, %v2542_v15 }
0x1d7e   :  { %v2557_v16 = vmul.f32 %v2555_v14, %v2541_v13 }
0x1d80   :  { %3207 = vmatprep.mubr.msk.f32.mxu0 %vm1253_vm5, %v2557_v16 }
0x1d81   :  { %3208 = vmatmul.mubr.msk.f32.vlgmr.msra.gmra.mrb[22].mxu0 %vm1253_vm5, %v2558_v17 }
0x1e54   :  { %v3209_v21 = vpop.f32.mrb[22].mxu0 }
0x1e55   :  { %v2642_v40 = vadd.f32 %v3209_v21, %v2860_v18  ;;  %v2636_v23 = vpop.f32.mrb[23].mxu0 }
0x1e56   :  { %v2637_v24 = vadd.f32 %v2860_v18, %v2636_v23 }
0x1e57   :  { %v2646_v26 = vadd.f32 %v2642_v40, %v2454_v54 }
0x1e58   :  { %v2645_v38 = vadd.f32 %v2637_v24, %v2453_v51 }
0x1e59   :  { %v2652_v22 = vsel %vm21_vm0, %v2646_v26, 0.0 }
0x1e5a   :  { %2653 = vadd.xlane.f32.xlu1 %v2652_v22  ;;  %v2649_v28 = vsel %vm21_vm0, %v2645_v38, 0.0 }
0x1e5b   :  { %2650 = vadd.xlane.f32.xlu0 %v2649_v28 }
0x1ee7   :  { %v2654_v29 = vpop.xlane.xlu1 %2653 }
0x1ee8   :  { %v2656_v19 = vmul.f32 0.03125, %v2654_v29  ;;  %v2651_v30 = vpop.xlane.xlu0 %2650 }
0x1ee9   :  { %v2655_v45 = vmul.f32 0.03125, %v2651_v30 }
0x1eea   :  { %v2658_v31 = vsub.f32 %v2646_v26, %v2656_v19 }
0x1eeb   :  { %v2657_v32 = vsub.f32 %v2645_v38, %v2655_v45 }
0x1eec   :  { %v2660_v34 = vmul.f32 %v2658_v31, %v2658_v31 }
0x1eed   :  { %v2659_v36 = vmul.f32 %v2657_v32, %v2657_v32 }
0x1eee   :  { %v2664_v37 = vsel %vm21_vm0, %v2660_v34, 0.0 }
0x1eef   :  { %2665 = vadd.xlane.f32.xlu1 %v2664_v37  ;;  %v2661_v39 = vsel %vm21_vm0, %v2659_v36, 0.0 }
0x1ef0   :  { %2662 = vadd.xlane.f32.xlu0 %v2661_v39 }
0x1f7c   :  { %v2666_v33 = vpop.xlane.xlu1 %2665 }
0x1f7d   :  { %v2668_v51 = vmul.f32 0.03125, %v2666_v33  ;;  %v2663_v53 = vpop.xlane.xlu0 %2662 }
0x1f7e   :  { %v2667_v54 = vmul.f32 0.03125, %v2663_v53 }
0x1f7f   :  { %v2670_v55 = vadd.f32 1e-12, %v2668_v51 }
0x1f80   :  { %v2669_v56 = vadd.f32 1e-12, %v2667_v54 }
0x1f81   :  { %3571 = vrsqrt.f32 %v2670_v55 }
0x1f82   :  { %3573 = vrsqrt.f32 %v2669_v56 }
0x1f8b   :  { %v3572_v57 = vpop.eup %3571 }
0x1f8c   :  { %v3574_v35 = vpop.eup %3573  ;;  %v2674_v59 = vmul.f32 %v3572_v57, %v2658_v31 }
0x1f8d   :  { %v2673_v60 = vmul.f32 %v3574_v35, %v2657_v32 }
0x1f8e   :  { %v2680_v41 = vmul.f32 %v2863_v58, %v2674_v59 }
0x1f8f   :  { %v2679_v62 = vmul.f32 %v2863_v58, %v2673_v60 }
0x1f90   :  { %v2686_v1 = vadd.f32 %v2864_v61, %v2680_v41 }
0x1f91   :  { %v2685_v63 = vadd.f32 %v2864_v61, %v2679_v62 }
0x1f93   :  { %3218 = vmatprep.mubr.msk.f32.mxu1 %vm21_vm0, %v2685_v63 }
0x1f94   :  { %3219 = vmatmul.mubr.msk.f32.vlgmr.msra.gmra.mrb[24].mxu1 %vm21_vm0, %v2686_v1 }
0x2067   :  { %v3220_v3 = vpop.f32.mrb[24].mxu1 }
0x2068   :  { %v2774_v49 = vadd.f32 %v3220_v3, %v2865_v2  ;;  %v2768_v4 = vpop.f32.mrb[25].mxu1 }
0x2069   :  { %v2769_v5 = vadd.f32 %v2865_v2, %v2768_v4 }
0x206a   :  { %2778 = vst [vmem:[%s4129_s4 + $0x8] sm:$0xff] %v2774_v49 }
0x206b   :  { %2777 = vst [vmem:[%s4129_s4] sm:$0xff] %v2769_v5 }

</bundles_post_ra>
